<compile_context>
chip_gen: v6e
topology: v6e:2x2x1
jax: 0.10.0
libtpu: 0.0.40
codegen_flags: <defaults>
</compile_context>

<pallas_src>
import functools

import jax
import jax.numpy as jnp
from jax.experimental import pallas as pl
from jax.experimental.pallas import tpu as pltpu


def _layer_norm_f32(x, gamma, beta, eps=1e-5):
    mean = jnp.mean(x, axis=-1, keepdims=True)
    var = jnp.mean((x - mean) ** 2, axis=-1, keepdims=True)
    inv = jax.lax.rsqrt(var + eps)
    return (x - mean) * inv * gamma + beta


def encoder_kernel(x_ref,
                   wqkv_ref, bqkv_ref,
                   wo_ref, bo_ref,
                   w1_ref, b1_ref, w2_ref, b2_ref,
                   gamma_ref, beta_ref,
                   o_ref,
                   *, num_heads, dk, bb, seq):
    f32 = jnp.float32
    bf16 = jnp.bfloat16
    m = bb * seq
    x = x_ref[...]                          # (M, D) bf16, M = bb*seq
    d_model = x.shape[-1]
    x_f32 = x.astype(f32)

    gamma = gamma_ref[...]
    beta = beta_ref[...]

    # ---------------- fused QKV projection (one lane-dense matmul) ----------------
    # 1/sqrt(dk) already folded into the Q columns / bias in the wrapper.
    qkv = jnp.dot(x, wqkv_ref[...], preferred_element_type=f32) + bqkv_ref[...]  # (M, 3D) f32

    # ---------------- head split: layout only (no matmuls) ----------------
    # (M, 3D) column slabs -> (H*bb, S, dk) bf16, head-major batch ordering.
    def split_heads(col0):
        slabs = [
            qkv[:, col0 + h * dk: col0 + (h + 1) * dk]
            .reshape(bb, seq, dk).astype(bf16)
            for h in range(num_heads)
        ]
        return jnp.concatenate(slabs, axis=0)            # (H*bb, S, dk)

    q3 = split_heads(0)
    k3 = split_heads(d_model)
    v3 = split_heads(2 * d_model)

    # ---------------- scores / softmax / context (head-batched, bf16 MXU) ----------------
    s = jnp.einsum('bqd,bkd->bqk', q3, k3, preferred_element_type=f32)   # (H*bb,S,S) f32
    s = s - jnp.max(s, axis=-1, keepdims=True)
    e = jnp.exp(s)
    p = e / jnp.sum(e, axis=-1, keepdims=True)           # exact softmax normalization
    ctx = jnp.einsum('bqk,bkd->bqd', p.astype(bf16), v3,
                     preferred_element_type=f32)          # (H*bb, S, dk) f32

    # ---------------- merge heads into lanes + single full-K output projection ----------------
    ctx2 = jnp.concatenate(
        [ctx[h * bb:(h + 1) * bb].reshape(m, dk) for h in range(num_heads)],
        axis=-1).astype(bf16)                             # (M, D) bf16
    mhe = jnp.dot(ctx2, wo_ref[...], preferred_element_type=f32) + bo_ref[...]

    # ---------------- residual + LayerNorm (f32 stats) ----------------
    y1 = _layer_norm_f32(mhe + x_f32, gamma, beta)

    # ---------------- feed-forward ----------------
    h1 = jnp.dot(y1.astype(bf16), w1_ref[...],
                 preferred_element_type=f32) + b1_ref[...]
    h1 = jnp.maximum(h1, 0.0)
    ff = jnp.dot(h1.astype(bf16), w2_ref[...],
                 preferred_element_type=f32) + b2_ref[...]

    # ---------------- residual + LayerNorm (shared params) ----------------
    out = _layer_norm_f32(ff + y1, gamma, beta)
    o_ref[...] = out.astype(o_ref.dtype)


def encoder_forward(x, params, *, num_heads, dk, batch_block=None,
                    param_dtype=jnp.bfloat16, out_dtype=None):
    B, S, D = x.shape
    assert num_heads * dk == D, "d_model must equal num_heads * dk"
    if batch_block is None:
        # >=2 "parallel" grid steps so both v7x TensorCores are used.
        # On v6e/v5e at real sizes, pass a larger batch_block (bigger M tiles
        # amortize the per-step overhead and keep the MXU fed).
        batch_block = max(1, B // 2)
    assert B % batch_block == 0
    assert (batch_block * S) % 8 == 0, "row tile must be sublane-aligned"
    grid = (B // batch_block,)
    m_blk = batch_block * S

    f32 = jnp.float32
    scale = 1.0 / (dk ** 0.5)

    # -------- fuse / restructure weights in the wrapper (free, outside kernel) --------
    wqkv = jnp.concatenate(
        [params["wq"] * scale, params["wk"], params["wv"]], axis=1
    ).astype(param_dtype)                                         # (D, 3D)
    bqkv = jnp.concatenate(
        [params["bq"] * scale, params["bk"], params["bv"]], axis=1
    ).astype(f32)                                                 # (1, 3D) lane-dense
    wo = params["wo"].astype(param_dtype)                         # (D, D) unsplit
    bo = params["bo"].astype(f32)
    w1 = params["w1"].astype(param_dtype)
    b1 = params["b1"].astype(f32)
    w2 = params["w2"].astype(param_dtype)
    b2 = params["b2"].astype(f32)
    gamma = params["gamma"].astype(f32)
    beta = params["beta"].astype(f32)

    # flatten batch into the matmul M dimension (free, done outside the kernel)
    x2d = x.reshape(B * S, D).astype(param_dtype)
    if out_dtype is None:
        out_dtype = x.dtype   # pass jnp.bfloat16 to halve output HBM writeback

    def full(shape):
        zeros = tuple(0 for _ in shape)
        return pl.BlockSpec(shape, lambda i, z=zeros: z)

    in_specs = [
        pl.BlockSpec((m_blk, D), lambda i: (i, 0)),        # activations row tile
        full(wqkv.shape), full(bqkv.shape),
        full(wo.shape), full(bo.shape),
        full(w1.shape), full(b1.shape),
        full(w2.shape), full(b2.shape),
        full(gamma.shape), full(beta.shape),
    ]

    kernel = functools.partial(encoder_kernel, num_heads=num_heads, dk=dk,
                               bb=batch_block, seq=S)

    out2d = pl.pallas_call(
        kernel,
        out_shape=jax.ShapeDtypeStruct((B * S, D), out_dtype),
        grid=grid,
        in_specs=in_specs,
        out_specs=pl.BlockSpec((m_blk, D), lambda i: (i, 0)),
        compiler_params=pltpu.CompilerParams(
            dimension_semantics=("parallel",),
            vmem_limit_bytes=32 * 1024 * 1024),
    )(x2d, wqkv, bqkv, wo, bo, w1, b1, w2, b2, gamma, beta)

    return out2d.reshape(B, S, D)


def encoder_reference(x, params, *, num_heads, dk):
    """Pure-JAX f32 reference mirroring the PyTorch forward."""
    B, S, D = x.shape
    q = x @ params["wq"] + params["bq"]
    k = x @ params["wk"] + params["bk"]
    v = x @ params["wv"] + params["bv"]
    q = q.reshape(B, S, num_heads, dk).transpose(0, 2, 1, 3)
    k = k.reshape(B, S, num_heads, dk).transpose(0, 2, 1, 3)
    v = v.reshape(B, S, num_heads, dk).transpose(0, 2, 1, 3)
    scores = jnp.einsum("bhqd,bhkd->bhqk", q, k) / (dk ** 0.5)
    attn = jax.nn.softmax(scores, axis=-1)
    ctx = jnp.einsum("bhqk,bhkd->bhqd", attn, v)
    ctx = ctx.transpose(0, 2, 1, 3).reshape(B, S, D)
    mhe = ctx @ params["wo"] + params["bo"]
    y1 = _layer_norm_f32(mhe + x, params["gamma"], params["beta"])
    ff = jnp.maximum(y1 @ params["w1"] + params["b1"], 0.0) @ params["w2"] + params["b2"]
    return _layer_norm_f32(ff + y1, params["gamma"], params["beta"])


if __name__ == "__main__":
    # Encoder(d_model, dk_model, batch_size, max_len); d_model chosen as a
    # multiple of 128 so activations / outputs are lane-dense on TPU.
    d_model = 128
    dk_model = 32
    num_heads = d_model // dk_model
    batch_size = 2
    max_len = 8
    d_ff = 4 * d_model   # TODO(synk): FeedForward hidden width assumed 4*d_model

    key = jax.random.PRNGKey(0)
    keys = jax.random.split(key, 16)
    init = lambda k, shape, s=0.05: jax.random.normal(k, shape, jnp.float32) * s

    params = {
        "wq": init(keys[0], (d_model, d_model)), "bq": init(keys[1], (1, d_model)),
        "wk": init(keys[2], (d_model, d_model)), "bk": init(keys[3], (1, d_model)),
        "wv": init(keys[4], (d_model, d_model)), "bv": init(keys[5], (1, d_model)),
        "wo": init(keys[6], (d_model, d_model)), "bo": init(keys[7], (1, d_model)),
        "w1": init(keys[8], (d_model, d_ff)),    "b1": init(keys[9], (1, d_ff)),
        "w2": init(keys[10], (d_ff, d_model)),   "b2": init(keys[11], (1, d_model)),
        "gamma": jnp.ones((1, d_model), jnp.float32),
        "beta": jnp.zeros((1, d_model), jnp.float32),
    }

    x = jax.random.normal(keys[12], (batch_size, max_len, d_model), jnp.float32)

    out = encoder_forward(x, params, num_heads=num_heads, dk=dk_model)
    out = jax.block_until_ready(out)

    ref = encoder_reference(x, params, num_heads=num_heads, dk=dk_model)
    assert out.shape == (batch_size, max_len, d_model)
    # bf16 weights / matmul operands with f32 accumulation + exact softmax
    # normalization => tighter tolerance than before (was 7e-2).
    max_err = float(jnp.max(jnp.abs(out - ref)))
    assert jnp.allclose(out, ref, atol=4e-2, rtol=4e-2), \
        f"mismatch vs reference (max err {max_err})"

    print("KERNEL_OK")
</pallas_src>

<mosaic_0001>
module attributes {stable_mosaic.version = 11 : i64} {
  func.func @encoder_kernel(%arg0: i32, %arg1: memref<8x128xbf16, #tpu.memory_space<vmem>>, %arg2: memref<128x384xbf16, #tpu.memory_space<vmem>>, %arg3: memref<1x384xf32, #tpu.memory_space<vmem>>, %arg4: memref<128x128xbf16, #tpu.memory_space<vmem>>, %arg5: memref<1x128xf32, #tpu.memory_space<vmem>>, %arg6: memref<128x512xbf16, #tpu.memory_space<vmem>>, %arg7: memref<1x512xf32, #tpu.memory_space<vmem>>, %arg8: memref<512x128xbf16, #tpu.memory_space<vmem>>, %arg9: memref<1x128xf32, #tpu.memory_space<vmem>>, %arg10: memref<1x128xf32, #tpu.memory_space<vmem>>, %arg11: memref<1x128xf32, #tpu.memory_space<vmem>>, %arg12: memref<8x128xf32, #tpu.memory_space<vmem>>) attributes {dimension_semantics = [#tpu.dimension_semantics<parallel>], iteration_bounds = array<i64: 2>, scalar_prefetch = 0 : i64, scratch_operands = 0 : i64, tpu.core_type = #tpu.core_type<tc>, window_params = [{transform_indices = @transform_0, window_bounds = array<i64: 8, 128>}, {pipeline_mode = #tpu.pipeline_mode<synchronous>, transform_indices = @transform_1, window_bounds = array<i64: 128, 384>}, {pipeline_mode = #tpu.pipeline_mode<synchronous>, transform_indices = @transform_2, window_bounds = array<i64: 1, 384>}, {pipeline_mode = #tpu.pipeline_mode<synchronous>, transform_indices = @transform_3, window_bounds = array<i64: 128, 128>}, {pipeline_mode = #tpu.pipeline_mode<synchronous>, transform_indices = @transform_4, window_bounds = array<i64: 1, 128>}, {pipeline_mode = #tpu.pipeline_mode<synchronous>, transform_indices = @transform_5, window_bounds = array<i64: 128, 512>}, {pipeline_mode = #tpu.pipeline_mode<synchronous>, transform_indices = @transform_6, window_bounds = array<i64: 1, 512>}, {pipeline_mode = #tpu.pipeline_mode<synchronous>, transform_indices = @transform_7, window_bounds = array<i64: 512, 128>}, {pipeline_mode = #tpu.pipeline_mode<synchronous>, transform_indices = @transform_8, window_bounds = array<i64: 1, 128>}, {pipeline_mode = #tpu.pipeline_mode<synchronous>, transform_indices = @transform_9, window_bounds = array<i64: 1, 128>}, {pipeline_mode = #tpu.pipeline_mode<synchronous>, transform_indices = @transform_10, window_bounds = array<i64: 1, 128>}, {transform_indices = @transform_11, window_bounds = array<i64: 8, 128>}]} {
    %c0 = arith.constant 0 : index
    %c0_0 = arith.constant 0 : index
    %0 = vector.load %arg1[%c0, %c0_0] : memref<8x128xbf16, #tpu.memory_space<vmem>>, vector<8x128xbf16>
    %1 = arith.extf %0 : vector<8x128xbf16> to vector<8x128xf32>
    %c0_1 = arith.constant 0 : index
    %c0_2 = arith.constant 0 : index
    %2 = vector.load %arg10[%c0_1, %c0_2] : memref<1x128xf32, #tpu.memory_space<vmem>>, vector<1x128xf32>
    %c0_3 = arith.constant 0 : index
    %c0_4 = arith.constant 0 : index
    %3 = vector.load %arg11[%c0_3, %c0_4] : memref<1x128xf32, #tpu.memory_space<vmem>>, vector<1x128xf32>
    %c0_5 = arith.constant 0 : index
    %c0_6 = arith.constant 0 : index
    %4 = vector.load %arg2[%c0_5, %c0_6] : memref<128x384xbf16, #tpu.memory_space<vmem>>, vector<128x384xbf16>
    %cst = arith.constant dense<0.000000e+00> : vector<8x384xf32>
    %5 = tpu.matmul %0, %4, %cst {dimension_numbers = #tpu.dot_dimension_numbers<[1], [0], [0], [1], [0, 0, 1, 1], [], []>} : vector<8x128xbf16>, vector<128x384xbf16>, vector<8x384xf32> -> vector<8x384xf32>
    %c0_7 = arith.constant 0 : index
    %c0_8 = arith.constant 0 : index
    %6 = vector.load %arg3[%c0_7, %c0_8] : memref<1x384xf32, #tpu.memory_space<vmem>>, vector<1x384xf32>
    %7 = vector.broadcast %6 : vector<1x384xf32> to vector<8x384xf32>
    %8 = arith.addf %5, %7 : vector<8x384xf32>
    %9 = vector.extract_strided_slice %8 {offsets = [0, 0], sizes = [8, 32], strides = [1, 1]} : vector<8x384xf32> to vector<8x32xf32>
    %10 = vector.shape_cast %9 : vector<8x32xf32> to vector<1x8x32xf32>
    %11 = arith.truncf %10 : vector<1x8x32xf32> to vector<1x8x32xbf16>
    %12 = vector.extract_strided_slice %8 {offsets = [0, 32], sizes = [8, 32], strides = [1, 1]} : vector<8x384xf32> to vector<8x32xf32>
    %13 = vector.shape_cast %12 : vector<8x32xf32> to vector<1x8x32xf32>
    %14 = arith.truncf %13 : vector<1x8x32xf32> to vector<1x8x32xbf16>
    %15 = vector.extract_strided_slice %8 {offsets = [0, 64], sizes = [8, 32], strides = [1, 1]} : vector<8x384xf32> to vector<8x32xf32>
    %16 = vector.shape_cast %15 : vector<8x32xf32> to vector<1x8x32xf32>
    %17 = arith.truncf %16 : vector<1x8x32xf32> to vector<1x8x32xbf16>
    %18 = vector.extract_strided_slice %8 {offsets = [0, 96], sizes = [8, 32], strides = [1, 1]} : vector<8x384xf32> to vector<8x32xf32>
    %19 = vector.shape_cast %18 : vector<8x32xf32> to vector<1x8x32xf32>
    %20 = arith.truncf %19 : vector<1x8x32xf32> to vector<1x8x32xbf16>
    %21 = tpu.concatenate %11, %14, %17, %20 in 0 : vector<1x8x32xbf16>, vector<1x8x32xbf16>, vector<1x8x32xbf16>, vector<1x8x32xbf16> -> vector<4x8x32xbf16>
    %22 = vector.extract_strided_slice %8 {offsets = [0, 128], sizes = [8, 32], strides = [1, 1]} : vector<8x384xf32> to vector<8x32xf32>
    %23 = vector.shape_cast %22 : vector<8x32xf32> to vector<1x8x32xf32>
    %24 = arith.truncf %23 : vector<1x8x32xf32> to vector<1x8x32xbf16>
    %25 = vector.extract_strided_slice %8 {offsets = [0, 160], sizes = [8, 32], strides = [1, 1]} : vector<8x384xf32> to vector<8x32xf32>
    %26 = vector.shape_cast %25 : vector<8x32xf32> to vector<1x8x32xf32>
    %27 = arith.truncf %26 : vector<1x8x32xf32> to vector<1x8x32xbf16>
    %28 = vector.extract_strided_slice %8 {offsets = [0, 192], sizes = [8, 32], strides = [1, 1]} : vector<8x384xf32> to vector<8x32xf32>
    %29 = vector.shape_cast %28 : vector<8x32xf32> to vector<1x8x32xf32>
    %30 = arith.truncf %29 : vector<1x8x32xf32> to vector<1x8x32xbf16>
    %31 = vector.extract_strided_slice %8 {offsets = [0, 224], sizes = [8, 32], strides = [1, 1]} : vector<8x384xf32> to vector<8x32xf32>
    %32 = vector.shape_cast %31 : vector<8x32xf32> to vector<1x8x32xf32>
    %33 = arith.truncf %32 : vector<1x8x32xf32> to vector<1x8x32xbf16>
    %34 = tpu.concatenate %24, %27, %30, %33 in 0 : vector<1x8x32xbf16>, vector<1x8x32xbf16>, vector<1x8x32xbf16>, vector<1x8x32xbf16> -> vector<4x8x32xbf16>
    %35 = vector.extract_strided_slice %8 {offsets = [0, 256], sizes = [8, 32], strides = [1, 1]} : vector<8x384xf32> to vector<8x32xf32>
    %36 = vector.shape_cast %35 : vector<8x32xf32> to vector<1x8x32xf32>
    %37 = arith.truncf %36 : vector<1x8x32xf32> to vector<1x8x32xbf16>
    %38 = vector.extract_strided_slice %8 {offsets = [0, 288], sizes = [8, 32], strides = [1, 1]} : vector<8x384xf32> to vector<8x32xf32>
    %39 = vector.shape_cast %38 : vector<8x32xf32> to vector<1x8x32xf32>
    %40 = arith.truncf %39 : vector<1x8x32xf32> to vector<1x8x32xbf16>
    %41 = vector.extract_strided_slice %8 {offsets = [0, 320], sizes = [8, 32], strides = [1, 1]} : vector<8x384xf32> to vector<8x32xf32>
    %42 = vector.shape_cast %41 : vector<8x32xf32> to vector<1x8x32xf32>
    %43 = arith.truncf %42 : vector<1x8x32xf32> to vector<1x8x32xbf16>
    %44 = vector.extract_strided_slice %8 {offsets = [0, 352], sizes = [8, 32], strides = [1, 1]} : vector<8x384xf32> to vector<8x32xf32>
    %45 = vector.shape_cast %44 : vector<8x32xf32> to vector<1x8x32xf32>
    %46 = arith.truncf %45 : vector<1x8x32xf32> to vector<1x8x32xbf16>
    %47 = tpu.concatenate %37, %40, %43, %46 in 0 : vector<1x8x32xbf16>, vector<1x8x32xbf16>, vector<1x8x32xbf16>, vector<1x8x32xbf16> -> vector<4x8x32xbf16>
    "tpu.trace_start"() <{level = 10 : i32, message = "bqd,bkd->bqk"}> : () -> ()
    %cst_9 = arith.constant dense<0.000000e+00> : vector<4x8x8xf32>
    %48 = tpu.matmul %21, %34, %cst_9 {dimension_numbers = #tpu.dot_dimension_numbers<[2], [2], [1], [1], [0, 0, 0, 1, 1, 1], [0], [0]>} : vector<4x8x32xbf16>, vector<4x8x32xbf16>, vector<4x8x8xf32> -> vector<4x8x8xf32>
    "tpu.trace_stop"() : () -> ()
    %cst_10 = arith.constant dense<0xFF800000> : vector<4x8xf32>
    %49 = vector.multi_reduction <maximumf>, %48, %cst_10 [2] : vector<4x8x8xf32> to vector<4x8xf32>
    %50 = vector.shape_cast %49 : vector<4x8xf32> to vector<4x8x1xf32>
    %51 = vector.broadcast %50 : vector<4x8x1xf32> to vector<4x8x8xf32>
    %52 = arith.subf %48, %51 : vector<4x8x8xf32>
    %53 = math.exp %52 : vector<4x8x8xf32>
    %cst_11 = arith.constant dense<0.000000e+00> : vector<4x8xf32>
    %54 = vector.multi_reduction <add>, %53, %cst_11 [2] : vector<4x8x8xf32> to vector<4x8xf32>
    %55 = vector.shape_cast %54 : vector<4x8xf32> to vector<4x8x1xf32>
    %56 = vector.broadcast %55 : vector<4x8x1xf32> to vector<4x8x8xf32>
    %57 = arith.divf %53, %56 : vector<4x8x8xf32>
    %58 = arith.truncf %57 : vector<4x8x8xf32> to vector<4x8x8xbf16>
    "tpu.trace_start"() <{level = 10 : i32, message = "bqk,bkd->bqd"}> : () -> ()
    %cst_12 = arith.constant dense<0.000000e+00> : vector<4x8x32xf32>
    %59 = tpu.matmul %58, %47, %cst_12 {dimension_numbers = #tpu.dot_dimension_numbers<[2], [1], [1], [2], [0, 0, 0, 1, 1, 2], [0], [0]>} : vector<4x8x8xbf16>, vector<4x8x32xbf16>, vector<4x8x32xf32> -> vector<4x8x32xf32>
    "tpu.trace_stop"() : () -> ()
    %60 = vector.extract_strided_slice %59 {offsets = [0, 0, 0], sizes = [1, 8, 32], strides = [1, 1, 1]} : vector<4x8x32xf32> to vector<1x8x32xf32>
    %61 = vector.shape_cast %60 : vector<1x8x32xf32> to vector<8x32xf32>
    %62 = vector.extract_strided_slice %59 {offsets = [1, 0, 0], sizes = [1, 8, 32], strides = [1, 1, 1]} : vector<4x8x32xf32> to vector<1x8x32xf32>
    %63 = vector.shape_cast %62 : vector<1x8x32xf32> to vector<8x32xf32>
    %64 = vector.extract_strided_slice %59 {offsets = [2, 0, 0], sizes = [1, 8, 32], strides = [1, 1, 1]} : vector<4x8x32xf32> to vector<1x8x32xf32>
    %65 = vector.shape_cast %64 : vector<1x8x32xf32> to vector<8x32xf32>
    %66 = vector.extract_strided_slice %59 {offsets = [3, 0, 0], sizes = [1, 8, 32], strides = [1, 1, 1]} : vector<4x8x32xf32> to vector<1x8x32xf32>
    %67 = vector.shape_cast %66 : vector<1x8x32xf32> to vector<8x32xf32>
    %68 = tpu.concatenate %61, %63, %65, %67 in 1 : vector<8x32xf32>, vector<8x32xf32>, vector<8x32xf32>, vector<8x32xf32> -> vector<8x128xf32>
    %69 = arith.truncf %68 : vector<8x128xf32> to vector<8x128xbf16>
    %c0_13 = arith.constant 0 : index
    %c0_14 = arith.constant 0 : index
    %70 = vector.load %arg4[%c0_13, %c0_14] : memref<128x128xbf16, #tpu.memory_space<vmem>>, vector<128x128xbf16>
    %cst_15 = arith.constant dense<0.000000e+00> : vector<8x128xf32>
    %71 = tpu.matmul %69, %70, %cst_15 {dimension_numbers = #tpu.dot_dimension_numbers<[1], [0], [0], [1], [0, 0, 1, 1], [], []>} : vector<8x128xbf16>, vector<128x128xbf16>, vector<8x128xf32> -> vector<8x128xf32>
    %c0_16 = arith.constant 0 : index
    %c0_17 = arith.constant 0 : index
    %72 = vector.load %arg5[%c0_16, %c0_17] : memref<1x128xf32, #tpu.memory_space<vmem>>, vector<1x128xf32>
    %73 = vector.broadcast %72 : vector<1x128xf32> to vector<8x128xf32>
    %74 = arith.addf %71, %73 : vector<8x128xf32>
    %75 = arith.addf %74, %1 : vector<8x128xf32>
    %cst_18 = arith.constant dense<0.000000e+00> : vector<8xf32>
    %76 = vector.multi_reduction <add>, %75, %cst_18 [1] : vector<8x128xf32> to vector<8xf32>
    %77 = vector.shape_cast %76 : vector<8xf32> to vector<8x1xf32>
    %cst_19 = arith.constant 1.280000e+02 : f32
    %78 = vector.broadcast %cst_19 : f32 to vector<8x1xf32>
    %79 = arith.divf %77, %78 : vector<8x1xf32>
    %80 = vector.broadcast %79 : vector<8x1xf32> to vector<8x128xf32>
    %81 = arith.subf %75, %80 : vector<8x128xf32>
    %82 = arith.mulf %81, %81 : vector<8x128xf32>
    %cst_20 = arith.constant dense<0.000000e+00> : vector<8xf32>
    %83 = vector.multi_reduction <add>, %82, %cst_20 [1] : vector<8x128xf32> to vector<8xf32>
    %84 = vector.shape_cast %83 : vector<8xf32> to vector<8x1xf32>
    %cst_21 = arith.constant 1.280000e+02 : f32
    %85 = vector.broadcast %cst_21 : f32 to vector<8x1xf32>
    %86 = arith.divf %84, %85 : vector<8x1xf32>
    %cst_22 = arith.constant 9.99999974E-6 : f32
    %87 = vector.broadcast %cst_22 : f32 to vector<8x1xf32>
    %88 = arith.addf %86, %87 : vector<8x1xf32>
    %89 = math.rsqrt %88 : vector<8x1xf32>
    %90 = vector.broadcast %79 : vector<8x1xf32> to vector<8x128xf32>
    %91 = arith.subf %75, %90 : vector<8x128xf32>
    %92 = vector.broadcast %89 : vector<8x1xf32> to vector<8x128xf32>
    %93 = arith.mulf %91, %92 : vector<8x128xf32>
    %94 = vector.broadcast %2 : vector<1x128xf32> to vector<8x128xf32>
    %95 = arith.mulf %93, %94 : vector<8x128xf32>
    %96 = vector.broadcast %3 : vector<1x128xf32> to vector<8x128xf32>
    %97 = arith.addf %95, %96 : vector<8x128xf32>
    %98 = arith.truncf %97 : vector<8x128xf32> to vector<8x128xbf16>
    %c0_23 = arith.constant 0 : index
    %c0_24 = arith.constant 0 : index
    %99 = vector.load %arg6[%c0_23, %c0_24] : memref<128x512xbf16, #tpu.memory_space<vmem>>, vector<128x512xbf16>
    %cst_25 = arith.constant dense<0.000000e+00> : vector<8x512xf32>
    %100 = tpu.matmul %98, %99, %cst_25 {dimension_numbers = #tpu.dot_dimension_numbers<[1], [0], [0], [1], [0, 0, 1, 1], [], []>} : vector<8x128xbf16>, vector<128x512xbf16>, vector<8x512xf32> -> vector<8x512xf32>
    %c0_26 = arith.constant 0 : index
    %c0_27 = arith.constant 0 : index
    %101 = vector.load %arg7[%c0_26, %c0_27] : memref<1x512xf32, #tpu.memory_space<vmem>>, vector<1x512xf32>
    %102 = vector.broadcast %101 : vector<1x512xf32> to vector<8x512xf32>
    %103 = arith.addf %100, %102 : vector<8x512xf32>
    %cst_28 = arith.constant 0.000000e+00 : f32
    %104 = vector.broadcast %cst_28 : f32 to vector<8x512xf32>
    %105 = arith.maximumf %103, %104 : vector<8x512xf32>
    %106 = arith.truncf %105 : vector<8x512xf32> to vector<8x512xbf16>
    %c0_29 = arith.constant 0 : index
    %c0_30 = arith.constant 0 : index
    %107 = vector.load %arg8[%c0_29, %c0_30] : memref<512x128xbf16, #tpu.memory_space<vmem>>, vector<512x128xbf16>
    %cst_31 = arith.constant dense<0.000000e+00> : vector<8x128xf32>
    %108 = tpu.matmul %106, %107, %cst_31 {dimension_numbers = #tpu.dot_dimension_numbers<[1], [0], [0], [1], [0, 0, 1, 1], [], []>} : vector<8x512xbf16>, vector<512x128xbf16>, vector<8x128xf32> -> vector<8x128xf32>
    %c0_32 = arith.constant 0 : index
    %c0_33 = arith.constant 0 : index
    %109 = vector.load %arg9[%c0_32, %c0_33] : memref<1x128xf32, #tpu.memory_space<vmem>>, vector<1x128xf32>
    %110 = vector.broadcast %109 : vector<1x128xf32> to vector<8x128xf32>
    %111 = arith.addf %108, %110 : vector<8x128xf32>
    %112 = arith.addf %111, %97 : vector<8x128xf32>
    %cst_34 = arith.constant dense<0.000000e+00> : vector<8xf32>
    %113 = vector.multi_reduction <add>, %112, %cst_34 [1] : vector<8x128xf32> to vector<8xf32>
    %114 = vector.shape_cast %113 : vector<8xf32> to vector<8x1xf32>
    %cst_35 = arith.constant 1.280000e+02 : f32
    %115 = vector.broadcast %cst_35 : f32 to vector<8x1xf32>
    %116 = arith.divf %114, %115 : vector<8x1xf32>
    %117 = vector.broadcast %116 : vector<8x1xf32> to vector<8x128xf32>
    %118 = arith.subf %112, %117 : vector<8x128xf32>
    %119 = arith.mulf %118, %118 : vector<8x128xf32>
    %cst_36 = arith.constant dense<0.000000e+00> : vector<8xf32>
    %120 = vector.multi_reduction <add>, %119, %cst_36 [1] : vector<8x128xf32> to vector<8xf32>
    %121 = vector.shape_cast %120 : vector<8xf32> to vector<8x1xf32>
    %cst_37 = arith.constant 1.280000e+02 : f32
    %122 = vector.broadcast %cst_37 : f32 to vector<8x1xf32>
    %123 = arith.divf %121, %122 : vector<8x1xf32>
    %cst_38 = arith.constant 9.99999974E-6 : f32
    %124 = vector.broadcast %cst_38 : f32 to vector<8x1xf32>
    %125 = arith.addf %123, %124 : vector<8x1xf32>
    %126 = math.rsqrt %125 : vector<8x1xf32>
    %127 = vector.broadcast %116 : vector<8x1xf32> to vector<8x128xf32>
    %128 = arith.subf %112, %127 : vector<8x128xf32>
    %129 = vector.broadcast %126 : vector<8x1xf32> to vector<8x128xf32>
    %130 = arith.mulf %128, %129 : vector<8x128xf32>
    %131 = vector.broadcast %2 : vector<1x128xf32> to vector<8x128xf32>
    %132 = arith.mulf %130, %131 : vector<8x128xf32>
    %133 = vector.broadcast %3 : vector<1x128xf32> to vector<8x128xf32>
    %134 = arith.addf %132, %133 : vector<8x128xf32>
    %c0_39 = arith.constant 0 : index
    %c0_40 = arith.constant 0 : index
    %135 = vector.load %arg12[%c0_39, %c0_40] : memref<8x128xf32, #tpu.memory_space<vmem>>, vector<8x128xf32>
    tpu.vector_store %arg12[%c0_39, %c0_40], %134 {strides = array<i32>} : memref<8x128xf32, #tpu.memory_space<vmem>>, vector<8x128xf32>,
    return
  }
  func.func @transform_0(%arg0: i32) -> (i32, i32) {
    %c0_i32 = arith.constant 0 : i32
    %c0_i32_0 = arith.constant 0 : i32
    return %arg0, %c0_i32 : i32, i32
  }
  func.func @transform_1(%arg0: i32) -> (i32, i32) {
    %c0_i32 = arith.constant 0 : i32
    %c0_i32_0 = arith.constant 0 : i32
    %c0_i32_1 = arith.constant 0 : i32
    return %c0_i32, %c0_i32_0 : i32, i32
  }
  func.func @transform_2(%arg0: i32) -> (i32, i32) {
    %c0_i32 = arith.constant 0 : i32
    %c0_i32_0 = arith.constant 0 : i32
    %c0_i32_1 = arith.constant 0 : i32
    return %c0_i32, %c0_i32_0 : i32, i32
  }
  func.func @transform_3(%arg0: i32) -> (i32, i32) {
    %c0_i32 = arith.constant 0 : i32
    %c0_i32_0 = arith.constant 0 : i32
    %c0_i32_1 = arith.constant 0 : i32
    return %c0_i32, %c0_i32_0 : i32, i32
  }
  func.func @transform_4(%arg0: i32) -> (i32, i32) {
    %c0_i32 = arith.constant 0 : i32
    %c0_i32_0 = arith.constant 0 : i32
    %c0_i32_1 = arith.constant 0 : i32
    return %c0_i32, %c0_i32_0 : i32, i32
  }
  func.func @transform_5(%arg0: i32) -> (i32, i32) {
    %c0_i32 = arith.constant 0 : i32
    %c0_i32_0 = arith.constant 0 : i32
    %c0_i32_1 = arith.constant 0 : i32
    return %c0_i32, %c0_i32_0 : i32, i32
  }
  func.func @transform_6(%arg0: i32) -> (i32, i32) {
    %c0_i32 = arith.constant 0 : i32
    %c0_i32_0 = arith.constant 0 : i32
    %c0_i32_1 = arith.constant 0 : i32
    return %c0_i32, %c0_i32_0 : i32, i32
  }
  func.func @transform_7(%arg0: i32) -> (i32, i32) {
    %c0_i32 = arith.constant 0 : i32
    %c0_i32_0 = arith.constant 0 : i32
    %c0_i32_1 = arith.constant 0 : i32
    return %c0_i32, %c0_i32_0 : i32, i32
  }
  func.func @transform_8(%arg0: i32) -> (i32, i32) {
    %c0_i32 = arith.constant 0 : i32
    %c0_i32_0 = arith.constant 0 : i32
    %c0_i32_1 = arith.constant 0 : i32
    return %c0_i32, %c0_i32_0 : i32, i32
  }
  func.func @transform_9(%arg0: i32) -> (i32, i32) {
    %c0_i32 = arith.constant 0 : i32
    %c0_i32_0 = arith.constant 0 : i32
    %c0_i32_1 = arith.constant 0 : i32
    return %c0_i32, %c0_i32_0 : i32, i32
  }
  func.func @transform_10(%arg0: i32) -> (i32, i32) {
    %c0_i32 = arith.constant 0 : i32
    %c0_i32_0 = arith.constant 0 : i32
    %c0_i32_1 = arith.constant 0 : i32
    return %c0_i32, %c0_i32_0 : i32, i32
  }
  func.func @transform_11(%arg0: i32) -> (i32, i32) {
    %c0_i32 = arith.constant 0 : i32
    %c0_i32_0 = arith.constant 0 : i32
    return %arg0, %c0_i32 : i32, i32
  }
}

</mosaic_0001>

<bundles_post_ra>
// kernel: tpu_custom_call.1
= control target key start
LH: loop header
LB: loop body
LE: loop exit
PB: predicated region body
PF: predicated region fallthrough
CT: control target
= control target key end

     0   :  { %s3342_s0 = inlined_call_operand.hbm [shape: bf16[16,128], index: 0, kind: input, shape index: {}]   ;;  %s3343_s1 = inlined_call_operand.hbm [shape: bf16[128,384], index: 1, kind: input, shape index: {}]   ;;  %s3344_s2 = inlined_call_operand.vmem [shape: f32[1,384], index: 2, kind: input, shape index: {}]   ;;  %s3345_s3 = inlined_call_operand.hbm [shape: bf16[128,128], index: 3, kind: input, shape index: {}]   ;;  %s3346_s4 = inlined_call_operand.hbm [shape: f32[1,128], index: 4, kind: input, shape index: {}]   ;;  %s3347_s5 = inlined_call_operand.hbm [shape: bf16[128,512], index: 5, kind: input, shape index: {}]   ;;  %s3348_s6 = inlined_call_operand.vmem [shape: f32[1,512], index: 6, kind: input, shape index: {}]   ;;  %s3349_s7 = inlined_call_operand.hbm [shape: bf16[512,128], index: 7, kind: input, shape index: {}]   ;;  %s3350_s8 = inlined_call_operand.vmem [shape: f32[1,128], index: 8, kind: input, shape index: {}]   ;;  %s3351_s9 = inlined_call_operand.vmem [shape: f32[1,128], index: 9, kind: input, shape index: {}]   ;;  %s3352_s10 = inlined_call_operand.vmem [shape: f32[1,128], index: 10, kind: input, shape index: {}]   ;;  %s3353_s11 = inlined_call_operand.hbm [shape: f32[16,128], index: 11, kind: output, shape index: {}]  }
   0x1   :  { %3358 = sst [smem:[#allocation20_spill]] %s3343_s1 }
   0x2   :  { %3359 = sst [smem:[#allocation21_spill]] %s3345_s3 }
   0x3   :  { %3360 = sst [smem:[#allocation22_spill]] %s3346_s4 }
   0x4   :  { %3361 = sst [smem:[#allocation23_spill]] %s3347_s5 }
   0x5   :  { %3362 = sst [smem:[#allocation24_spill]] %s3349_s7 }
   0x6   :  { %16 = vsyncpa [#allocation3], 0 }
   0x7   :  { %18 = vsyncpa [#allocation3 + $0x1], 0 }
   0x8   :  { %19 = vsyncpa [#allocation6], 0 }
   0x9   :  { %20 = vsyncpa [#allocation9], 0 }
   0xa   :  { %21 = vsyncpa [#allocation12], 0 }
   0xb   :  { %22 = vsyncpa [#allocation4], 0 }
   0xc   :  { %24 = vsyncpa [#allocation4 + $0x1], 0  ;;  %s2990_s17 = smov 0   ;;  %s2992_s18 = smov 0  }
   0xd   :  { %s2994_s19 = smov 0   ;;  %s2996_s20 = smov 0  }
   0xe LB: > { %s2911_s21 = smov [#allocation5]   ;;  %s3011_s23 = sadd.s32 4294967295, %s2909_s20   ;;  %s2909_s20 = sphi %s2996_s20, %s3391_s20   ;;  %s2905_s19 = sphi %s2994_s19, %s3390_s19   ;;  %s2901_s18 = sphi %s2992_s18, %s3389_s18   ;;  %s2897_s17 = sphi %s2990_s17, %s3388_s17  }
   0xf   : > { %s309_s22 = sshll.u32 %s2911_s21, 4  ;;  %p2131_p0 = scmp.ge.s32.totalorder %s2909_s20, 1  ;;  %s310_s22 = int_to_ptr.vmem [resolvable:$true] %s309_s22 }
  0x10   : > { %p3354_p1 = scmp.eq.s32.totalorder %s3011_s23, 0  ;;  %p297_p2 = scmp.lt.s32.totalorder %s2909_s20, 3 }
  0x11   : > { %s2912_s25 = smov [#allocation8]   ;;  %s2913_s28 = smov [#allocation7]  }
  0x12   : > { %p3016_p3 = pnand %p2131_p0, %p297_p2  ;;  %s339_s26 = sshll.u32 %s2912_s25, 4  ;;  %s340_s26 = int_to_ptr.vmem [resolvable:$true] %s339_s26 }
  0x13   : > { %s325_s29 = sshll.u32 %s2913_s28, 4  ;;  %s2686_s12 = scalar_lea.vmem %s310_s22, 3072  ;;  %s3029_s29 = int_to_ptr.vmem [resolvable:$true] %s325_s29 }
  0x14   : > { %s3363_s24 = scalar_select %p3016_p3, 1, 0 }
  0x15   : > { %p2450_p5 = pneg %p3016_p3  ;;  %p2687_p8 = scmp.ne.s32.totalorder %s310_s22, %s2686_s12 }
  0x16   : > { %p2694_p11 = scmp.lt.s32.totalorder %s310_s22, %s310_s22  ;;  %p2695_p12 = scmp.lt.s32.totalorder %s2686_s12, %s2686_s12 }
  0x17   : > { %p3025_p6 = pnand %p2450_p5, %p3354_p1 }
  0x18   : > { %p2696_p13 = por %p2695_p12, %p2694_p11 }
  0x19   : > { %p3033_p7 = pneg %p3025_p6 }
  0x1b   : > { %p2689_p9 = pnand %p2687_p8, %p3033_p7 }
  0x1d   : > { %p2690_p10 = pneg %p2689_p9 }
  0x1f   : > { %p2697_p0 = pnand %p2696_p13, %p2690_p10 }
  0x21   : > { %2700 = shalt.err (!%p2697_p0)
}
  0x22   : > { %s2914_s13 = smov 192   ;;  %s2915_s14 = smov 12  }
  0x23   : > { %s3366_s1 = sld [smem:[#allocation20_spill]]  ;;  %s2712_s21 = scalar_lea.vmem %s340_s26, 16 }
  0x24   : > { %p2713_p2 = scmp.ne.s32.totalorder %s340_s26, %s2712_s21  ;;  %s2719_s25 = scalar_lea.vmem %s340_s26, 32 }
  0x25   : > { %p2720_p9 = scmp.lt.s32.totalorder %s340_s26, %s340_s26  ;;  %p2721_p4 = scmp.lt.s32.totalorder %s2719_s25, %s2712_s21 }
  0x26   : > { %p2715_p5 = pnand %p2713_p2, %p3033_p7 }
  0x27   : > { %p2722_p11 = por %p2721_p4, %p2720_p9 }
  0x28   : > { %p2716_p8 = pneg %p2715_p5 }
  0x29   : > { %2453 = dma.hbm_to_vmem [thread:$0]  (!%p3025_p6), %s3366_s1, 3072, %s310_s22, [#allocation6], %s2914_s13, %s2914_s13, %s2915_s14  }
  0x2a   : > { %p2723_p10 = pnand %p2722_p11, %p2716_p8 }
  0x2c   : > { %2726 = shalt.err (!%p2723_p10)
}
  0x2d   : > { %s3367_s4 = sld [smem:[#allocation22_spill]]  ;;  %s2738_s22 = scalar_lea.vmem %s3029_s29, 1024 }
  0x2e   : > { %p2739_p12 = scmp.ne.s32.totalorder %s3029_s29, %s2738_s22  ;;  %p2746_p2 = scmp.lt.s32.totalorder %s3029_s29, %s3029_s29 }
  0x2f   : > { %p2747_p4 = scmp.lt.s32.totalorder %s2738_s22, %s2738_s22 }
  0x30   : > { %p2741_p13 = pnand %p2739_p12, %p3033_p7 }
  0x31   : > { %p2748_p5 = por %p2747_p4, %p2746_p2 }
  0x32   : > { %p2742_p0 = pneg %p2741_p13 }
  0x33   : > { %2459 = dma.hbm_to_vmem [thread:$0]  (!%p3025_p6), %s3367_s4, 16, %s340_s26, [#allocation9]  }
  0x34   : > { %p2749_p8 = pnand %p2748_p5, %p2742_p0 }
  0x36   : > { %2752 = shalt.err (!%p2749_p8)
}
  0x37   : > { %s2916_s13 = smov 64   ;;  %s2917_s14 = smov 4  }
  0x38   : > { %s3368_s3 = sld [smem:[#allocation21_spill]]  ;;  %s2918_s16 = smov [#allocation10]  }
  0x39   : > { %s349_s21 = sshll.u32 %s2918_s16, 4  ;;  %s350_s21 = int_to_ptr.vmem [resolvable:$true] %s349_s21 }
  0x3a   : > { %s2764_s25 = scalar_lea.vmem %s350_s21, 4096  ;;  %p2772_p12 = scmp.lt.s32.totalorder %s350_s21, %s350_s21 }
  0x3b   : > { %p2765_p9 = scmp.ne.s32.totalorder %s350_s21, %s2764_s25  ;;  %p2773_p13 = scmp.lt.s32.totalorder %s2764_s25, %s2764_s25 }
  0x3d   : > { %p2767_p11 = pnand %p2765_p9, %p3033_p7  ;;  %p2774_p0 = por %p2773_p13, %p2772_p12 }
  0x3e   : > { %2456 = dma.hbm_to_vmem [thread:$0]  (!%p3025_p6), %s3368_s3, 1024, %s3029_s29, [#allocation6], %s2916_s13, %s2916_s13, %s2917_s14  }
  0x3f   : > { %p2768_p10 = pneg %p2767_p11 }
  0x41   : > { %p2775_p2 = pnand %p2774_p0, %p2768_p10 }
  0x43   : > { %2778 = shalt.err (!%p2775_p2)
}
  0x44   : > { %s2919_s28 = smov 256   ;;  %s2920_s12 = smov 16  }
  0x45   : > { %s3369_s5 = sld [smem:[#allocation23_spill]]  ;;  %s2921_s26 = smov [#allocation11]  }
  0x46   : > { %s365_s15 = sshll.u32 %s2921_s26, 4  ;;  %s366_s15 = int_to_ptr.vmem [resolvable:$true] %s365_s15 }
  0x47   : > { %s2790_s16 = scalar_lea.vmem %s366_s15, 4096  ;;  %p2798_p9 = scmp.lt.s32.totalorder %s366_s15, %s366_s15 }
  0x48   : > { %p2791_p4 = scmp.ne.s32.totalorder %s366_s15, %s2790_s16  ;;  %p2799_p11 = scmp.lt.s32.totalorder %s2790_s16, %s2790_s16 }
  0x4a   : > { %p2793_p5 = pnand %p2791_p4, %p3033_p7  ;;  %p2800_p10 = por %p2799_p11, %p2798_p9 }
  0x4b   : > { %2462 = dma.hbm_to_vmem [thread:$0]  (!%p3025_p6), %s3369_s5, 4096, %s350_s21, [#allocation9], %s2919_s28, %s2919_s28, %s2920_s12  }
  0x4c   : > { %p2794_p8 = pneg %p2793_p5 }
  0x4e   : > { %p2801_p12 = pnand %p2800_p10, %p2794_p8 }
  0x50   : > { %2804 = shalt.err (!%p2801_p12)
}
  0x51   : > { %s3370_s7 = sld [smem:[#allocation24_spill]]  ;;  %s2130_s27 = sadd.s32 4294967294, %s2909_s20  }
  0x52   : > { %s3085_s30 = sadd.s32 1, %s2909_s20   ;;  %s37_s28 = sadd.s32 1, %s2905_s19 }
  0x53   : > { %s34_s12 = ssub.s32 %s2909_s20, %s3085_s30  ;;  %p44_p7 = scmp.ne.s32.totalorder %s2905_s19, %s2901_s18 }
  0x54   : > { %p35_p13 = scmp.eq.s32.totalorder %s34_s12, 0  ;;  %p45_p0 = scmp.eq.s32.totalorder %s2909_s20, 0 }
  0x55   : > { %p50_p2 = scmp.ne.s32.totalorder %s2901_s18, %s2897_s17  ;;  %p284_p4 = scmp.eq.s32.totalorder %s3011_s23, 1 }
  0x56   : > { %s3097_s22 = scalar_select %p35_p13, %s2905_s19, %s37_s28  }
  0x57   : > { %2465 = dma.hbm_to_vmem [thread:$0]  (!%p3025_p6), %s3370_s7, 4096, %s366_s15, [#allocation12], %s2916_s13, %s2916_s13, %s2917_s14  }
  0x58   : > { %3371 = sst [smem:[#allocation19_spill]] %s3097_s22  ;;  %p46_p5 = por %p45_p0, %p44_p7 }
  0x59   : > { %p3101_p8 = por %p3354_p1, %p50_p2  ;;  %p3105_p6 = por %p284_p4, %p44_p7 }
  0x5a   : > { %p290_p9 = scmp.eq.s32.totalorder %s2130_s27, 1  ;;  %p2479_p11 = scmp.lt.s32.totalorder %s2909_s20, 2 }
  0x5b   : > { %s3372_s29 = scalar_select %p3101_p8, 1, 0 }
  0x5c   : > { %s3373_s13 = scalar_select %p3105_p6, 1, 0 }
  0x5d   : > { %s388_s14 = sand.u32 1, %s2905_s19   ;;  %p3111_p10 = por %p290_p9, %p50_p2 }
  0x5e   : > { %s2138_s15 = sshll.u32 %s388_s14, 2  ;;  %s2139_s16 = sshll.u32 %s2909_s20, 6 }
  0x5f   : > { %s3374_s26 = scalar_select %p3111_p10, 1, 0 }
  0x60   : > { %s3119_s28 = scalar_lea.hbm %s3342_s0, %s2139_s16  ;;  %s392_s12 = scalar_lea.vmem [#allocation2], %s2138_s15 }
  0x61   : > { %s399_s1 = sshll.u32 %s392_s12, 4  ;;  %p3121_p12 = pnand %p2479_p11, %p46_p5  ;;  %s400_s1 = int_to_ptr.vmem [resolvable:$true] %s399_s1 }
  0x62   : > { %s389_s3 = scalar_lea.sflag [#allocation3], %s388_s14  ;;  %s2805_s4 = scalar_lea.hbm %s3119_s28, 64 }
  0x63   : > { %p2806_p7 = scmp.ne.s32.totalorder %s3119_s28, %s2805_s4  ;;  %p2807_p13 = pneg %p3121_p12 }
  0x64   : > { %s2810_s21 = scalar_lea.hbm %s3342_s0, 128  ;;  %p2811_p4 = scmp.lt.s32.totalorder %s3119_s28, %s3342_s0 }
  0x65   : > { %p2808_p0 = pnand %p2807_p13, %p2806_p7  ;;  %p2812_p5 = scmp.lt.s32.totalorder %s2810_s21, %s2805_s4 }
  0x67   : > { %p2809_p2 = pneg %p2808_p0  ;;  %p2813_p9 = por %p2812_p5, %p2811_p4 }
  0x69   : > { %p2814_p11 = pnand %p2813_p9, %p2809_p2 }
  0x6b   : > { %2817 = shalt.err (!%p2814_p11)
}
  0x6c   : > { %s2818_s12 = scalar_lea.vmem %s400_s1, 64  ;;  %s2922_s14 = smov [#allocation2]  }
  0x6d   : > { %p2819_p1 = scmp.ne.s32.totalorder %s400_s1, %s2818_s12  ;;  %s2823_s7 = sshll.u32 %s2922_s14, 4  ;;  %s2824_s7 = int_to_ptr.vmem [resolvable:$false] %s2823_s7 }
  0x6e   : > { %s2825_s22 = scalar_lea.vmem %s2824_s7, 128  ;;  %p2826_p7 = scmp.lt.s32.totalorder %s400_s1, %s2824_s7 }
  0x6f   : > { %p2821_p10 = pnand %p2819_p1, %p2807_p13  ;;  %p2827_p0 = scmp.lt.s32.totalorder %s2825_s22, %s2818_s12 }
  0x71   : > { %p2822_p6 = pneg %p2821_p10  ;;  %p2828_p8 = por %p2827_p0, %p2826_p7 }
  0x73   : > { %p2829_p3 = pnand %p2828_p8, %p2822_p6 }
  0x75   : > { %2832 = shalt.err (!%p2829_p3)
}
  0x76   : > { %2469 = dma.hbm_to_vmem [thread:$0]  (!%p3121_p12), %s3119_s28, 64, %s400_s1, %s389_s3  }
  0x77   : > { %p3376_p2 = scmp.ne.s32.totalorder %s3363_s24, 0 }
  0x78   : > { %s3142_s4 = sand.u32 (!%p3376_p2), 1, %s2901_s18   ;;  %p3377_p1 = scmp.ne.s32.totalorder (!%p3376_p2), %s3372_s29, 0 }
  0x79   : > { %408 = sbr.rel (%p3376_p2) target bundleno = 2555 (0x9fb), region = 64  ;;  %s2141_s5 = sshll.u32 (!%p3376_p2), %s3142_s4, 2 }
  0x7a   : > { %s411_s16 = scalar_lea.sflag (!%p3376_p2), [#allocation3], %s3142_s4  ;;  %s3146_s7 = scalar_lea.vmem (!%p3376_p2), [#allocation2], %s2141_s5 }
  0x7e   : > { %2876 = dma.done.wait (%p3377_p1), %s411_s16, 64  }
  0x7f   : > { %2878 = vsyncadd (%p3377_p1), %s411_s16, 4294967232  ;;  %p3378_p3 = scmp.eq.s32.totalorder %s3011_s23, 0 }
  0x81   : > { %2880 = dma.done.wait (%p3378_p3), [#allocation6], 4096   ;;  %p3379_p8 = pmov %p3378_p3 }
  0x82   : > { %p3380_p6 = pmov %p3378_p3 }
  0x83   : > { %2882 = vsyncadd (%p3379_p8), [#allocation6], 4294963200 }
  0x84   : > { %2884 = dma.done.wait (%p3380_p6), [#allocation9], 4112   ;;  %p3381_p10 = pmov %p3378_p3 }
  0x85   : > { %p3382_p12 = pmov %p3378_p3 }
  0x86   : > { %2886 = vsyncadd (%p3381_p10), [#allocation9], 4294963184 }
  0x87   : > { %2888 = dma.done.wait (%p3382_p12), [#allocation12], 4096   ;;  %p3383_p13 = pmov %p3378_p3 }
  0x88   : > { %v2923_v0 = vmov 0   ;;  %v2924_v1 = vmov 0.0   ;;  %v2535_v2 = vld [vmem:[#allocation5 + $0xac] ss:$12 sps:$4 sm:$0xff]   ;;  %v2537_v3 = vld [vmem:[#allocation5 + $0xa8] ss:$12 sps:$4 sm:$0xff]   ;;  %v512_v27 = vlaneseq }
  0x89   : > { %2890 = vsyncadd (%p3383_p13), [#allocation12], 4294963200  ;;  %687 = vmatprep.mubr.bf16.mxu0 %v2923_v0  ;;  %2338 = vmatprep.subr.bf16.mxu1 %v2924_v1  ;;  %v2538_v4 = vld [vmem:[#allocation5 + $0x94] ss:$12 sps:$4 sm:$0xff]   ;;  %v2540_v5 = vld [vmem:[#allocation5 + $0x90] ss:$12 sps:$4 sm:$0xff]  }
  0x8a   : > { %655 = vmatprep.subr.bf16.mxu0 %v2535_v2  ;;  %v2541_v6 = vld [vmem:[#allocation5 + $0x7c] ss:$12 sps:$4 sm:$0xff]   ;;  %v2543_v7 = vld [vmem:[#allocation5 + $0x78] ss:$12 sps:$4 sm:$0xff]   ;;  %v2546_v9 = vld [vmem:[#allocation5 + $0x60] ss:$12 sps:$4 sm:$0xff]  }
  0x8b   : > { %656 = vmatpush1.bf16.msra.mxu0 %v2537_v3  ;;  %v2544_v8 = vld [vmem:[#allocation5 + $0x64] ss:$12 sps:$4 sm:$0xff]   ;;  %v2547_v11 = vld [vmem:[#allocation5 + $0x4c] ss:$12 sps:$4 sm:$0xff]   ;;  %v2549_v13 = vld [vmem:[#allocation5 + $0x48] ss:$12 sps:$4 sm:$0xff]  }
  0x8c   : > { %657 = vmatprep.subr.bf16.mxu0 %v2538_v4  ;;  %v2559_v10 = vld [vmem:[#allocation5 + $0xb0] ss:$12 sps:$4 sm:$0xff]   ;;  %v2560_v12 = vld [vmem:[#allocation5 + $0x98] ss:$12 sps:$4 sm:$0xff]   ;;  %v2550_v14 = vld [vmem:[#allocation5 + $0x34] ss:$12 sps:$4 sm:$0xff]  }
  0x8d   : > { %2339 = vmatpush3.bf16.msra.mxu1 %v2559_v10  ;;  %v2552_v15 = vld [vmem:[#allocation5 + $0x30] ss:$12 sps:$4 sm:$0xff]   ;;  %v2561_v16 = vld [vmem:[#allocation5 + $0x80] ss:$12 sps:$4 sm:$0xff]   ;;  %v2562_v18 = vld [vmem:[#allocation5 + $0x68] ss:$12 sps:$4 sm:$0xff]  }
  0x8e   : > { %2340 = vmatprep.subr.bf16.mxu1 %v2924_v1  ;;  %v2553_v17 = vld [vmem:[#allocation5 + $0x1c] ss:$12 sps:$4 sm:$0xff]   ;;  %v2555_v19 = vld [vmem:[#allocation5 + $0x18] ss:$12 sps:$4 sm:$0xff]   ;;  %v2558_v22 = vld [vmem:[#allocation5] ss:$12 sps:$4 sm:$0xff]  }
  0x8f   : > { %658 = vmatpush1.bf16.msra.mxu0 %v2540_v5  ;;  %v2556_v20 = vld [vmem:[#allocation5 + $0x4] ss:$12 sps:$4 sm:$0xff]   ;;  %v3171_v24 = vld [vmem:[%s3146_s7] sm:$0xf]  ;;  %v2565_v25 = vld [vmem:[#allocation5 + $0x20] ss:$12 sps:$4 sm:$0xff]  }
  0x90   : > { %659 = vmatprep.subr.bf16.mxu0 %v2541_v6  ;;  %v2563_v21 = vld [vmem:[#allocation5 + $0x50] ss:$12 sps:$4 sm:$0xff]   ;;  %v2564_v23 = vld [vmem:[#allocation5 + $0x38] ss:$12 sps:$4 sm:$0xff]   ;;  %v2566_v26 = vld [vmem:[#allocation5 + $0x8] ss:$12 sps:$4 sm:$0xff]  }
  0x91   : > { %2341 = vmatpush3.bf16.msra.mxu1 %v2560_v12  ;;  %vm2925_vm0 = vmmov 0   ;;  %v3186_v28 = vshrl.u32 %v512_v27, 7  ;;  %v510_v31 = vld [vmem:[%s3344_s2] sm:$0x7]  ;;  %vm760_vm1 = vcmask 261120   ;;  %s2926_s24 = smov 64  }
  0x92   : > { %2342 = vmatprep.subr.bf16.mxu1 %v2924_v1  ;;  %2354 = vmatprep.mubr.msk.bf16.mxu1 %vm2925_vm0, %v2924_v1  ;;  %s2927_s22 = smov 96   ;;  %s2928_s29 = smov 32   ;;  %vm997_vm2 = vcmask 1043456   ;;  %vm945_vm3 = vcmask 64512   ;;  %vm1192_vm4 = vcmask 523264   ;;  %vm1194_vm5 = vcmask 785408  }
  0x93   : > { %660 = vmatpush1.bf16.msra.mxu0 %v2543_v7  ;;  %v518_v29 = vsub.s32 1, %v3186_v28  ;;  %v514_v30 = vsub.s32 0, %v3186_v28  ;;  %v522_v43 = vsub.s32 2, %v3186_v28  ;;  %s2147_s16 = sshll.u32 %s3142_s4, 3  ;;  %s2257_s7 = sshll.u32 %s3011_s23, 7 }
  0x94   : > { %661 = vmatprep.subr.bf16.mxu0 %v2544_v8  ;;  %s472_s1 = scalar_lea.vmem [#allocation13], %s2147_s16  ;;  %s1999_s28 = scalar_lea.sflag [#allocation4], %s3142_s4 }
  0x95   : > { %2343 = vmatpush3.bf16.msra.mxu1 %v2561_v16  ;;  %v519_v32 = vrot.slane %v510_v31, %v518_v29  ;;  %v515_v34 = vrot.slane %v510_v31, %v514_v30  ;;  %v523_v46 = vrot.slane %v510_v31, %v522_v43  ;;  %s2012_s3 = sshll.u32 %s472_s1, 4  ;;  %p3384_p5 = scmp.ne.s32.totalorder %s3373_s13, 0  ;;  %s2013_s3 = int_to_ptr.vmem [resolvable:$true] %s2012_s3 }
  0x96   : > { %2344 = vmatprep.subr.bf16.mxu1 %v2924_v1  ;;  %s2833_s27 = scalar_lea.vmem %s2013_s3, 128  ;;  %s2929_s25 = smov [#allocation13]  }
  0x97   : > { %662 = vmatpush1.bf16.msra.mxu0 %v2546_v9  ;;  %p2834_p4 = scmp.ne.s32.totalorder %s2013_s3, %s2833_s27  ;;  %s2837_s23 = sshll.u32 %s2929_s25, 4  ;;  %s2838_s23 = int_to_ptr.vmem [resolvable:$false] %s2837_s23 }
  0x98   : > { %663 = vmatprep.subr.bf16.mxu0 %v2547_v11  ;;  %s2839_s21 = scalar_lea.vmem %s2838_s23, 256  ;;  %p2840_p7 = scmp.lt.s32.totalorder %s2013_s3, %s2838_s23 }
  0x99   : > { %2345 = vmatpush3.bf16.msra.mxu1 %v2562_v18  ;;  %p2835_p9 = pnand %p2834_p4, %p3384_p5  ;;  %p2841_p0 = scmp.lt.s32.totalorder %s2839_s21, %s2833_s27 }
  0x9a   : > { %2346 = vmatprep.subr.bf16.mxu1 %v2924_v1 }
  0x9b   : > { %664 = vmatpush1.bf16.msra.mxu0 %v2549_v13  ;;  %p2836_p11 = pneg %p2835_p9  ;;  %p2842_p2 = por %p2841_p0, %p2840_p7 }
  0x9c   : > { %665 = vmatprep.subr.bf16.mxu0 %v2550_v14 }
  0x9d   : > { %2347 = vmatpush3.bf16.msra.mxu1 %v2563_v21  ;;  %p2843_p1 = pnand %p2842_p2, %p2836_p11 }
  0x9e   : > { %2348 = vmatprep.subr.bf16.mxu1 %v2924_v1 }
  0x9f   : > { %666 = vmatpush1.bf16.msra.mxu0 %v2552_v15 }
  0xa0   : > { %667 = vmatprep.subr.bf16.mxu0 %v2553_v17 }
  0xa1   : > { %2349 = vmatpush3.bf16.msra.mxu1 %v2564_v23 }
  0xa2   : > { %2350 = vmatprep.subr.bf16.mxu1 %v2924_v1 }
  0xa3   : > { %668 = vmatpush1.bf16.msra.mxu0 %v2555_v19 }
  0xa4   : > { %669 = vmatprep.subr.bf16.mxu0 %v2556_v20 }
  0xa5   : > { %2351 = vmatpush3.bf16.msra.mxu1 %v2565_v25 }
  0xa6   : > { %2352 = vmatprep.subr.bf16.mxu1 %v2924_v1 }
  0xa7   : > { %670 = vmatpush1.bf16.msra.mxu0 %v2558_v22 }
  0xa8   : > { %2382 = vmatprep.subr.bf16.mxu0 %v2924_v1 }
  0xa9   : > { %2353 = vmatpush3.bf16.msra.mxu1 %v2566_v26 }
  0xaa   : > { %688 = vmatmul.mubr.bf16.vlgmr.msra.gmra.mxu0 %v3171_v24  ;;  %2358 = vmatprep.subr.bf16.mxu1 %v2924_v1 }
  0xab   : > { %2384 = vmatprep.mubr.msk.bf16.mxu0 %vm2925_vm0, %v2924_v1 }
  0xac   : > { %2355 = vmatmul.mubr.bf16.vlgmr.msra.gmra.mxu1 %v3171_v24 }
  0xad   : > { %2360 = vmatprep.mubr.msk.bf16.mxu1 %vm2925_vm0, %v2924_v1 }
 0x16a   : > { %v689_v33 = vpop.f32.mrf.mxu0 }
 0x16b   : > { %v690_v38 = vadd.f32 %v689_v33, %v515_v34 }
 0x16c   : > { %v691_v35 = vpop.f32.mrf.mxu0  ;;  %v730_v44 = vpop.f32.mrf.mxu1 }
 0x16d   : > { %v692_v36 = vadd.f32 %v691_v35, %v519_v32  ;;  %v736_v42 = vpack.c.bf16 %v690_v38, %v690_v38  ;;  %v731_v49 = vadd.f32 %v730_v44, %v523_v46 }
 0x16e   : > { %v693_v37 = vpop.f32.mrf.mxu0  ;;  %v2356_v45 = vpop.f32.mrf.mxu1 }
 0x16f   : > { %v744_v39 = vpack.c.bf16 %v692_v36, %v692_v36  ;;  %v3211_v50 = vpack.c.bf16 %v731_v49, %v731_v49 }
 0x170   : > { %v694_v40 = vpop.f32.mrf.mxu0  ;;  %v733_v47 = vpop.f32.mrf.mxu1 }
 0x171   : > { %748 = vrot.lane.b32.xlu1 %v744_v39, %s2926_s24  ;;  %746 = vrot.lane.b32.xlu0 %v744_v39, %s2927_s22  ;;  %v765_v41 = vsel %vm760_vm1, %v744_v39, 0  ;;  %v999_v51 = vsel %vm997_vm2, %v3211_v50, 0 }
 0x172   : > { %2359 = vmatpush3.bf16.xpose.msra.mxu1 %v765_v41  ;;  %v2357_v48 = vpop.f32.mrf.mxu1  ;;  %2383 = vmatpush3.bf16.msra.mxu0 %v999_v51 }
 0x173   : > { %2364 = vmatprep.subr.bf16.mxu1 %v2924_v1  ;;  %2394 = vmatprep.subr.bf16.mxu0 %v2924_v1 }
 0x175   : > { %740 = vrot.lane.b32.xlu1 %v736_v42, %s2926_s24  ;;  %738 = vrot.lane.b32.xlu0 %v736_v42, %s2927_s22 }
 0x179   : > { %742 = vrot.lane.b32.xlu1 %v736_v42, %s2928_s29  ;;  %750 = vrot.lane.b32.xlu0 %v744_v39, %s2928_s29 }
 0x17a   : > { %2361 = vmatmul.mubr.msk.bf16.vlgmr.msra.gmra.mxu1 %vm760_vm1, %v736_v42 }
 0x17b   : > { %2366 = vmatprep.mubr.msk.bf16.mxu1 %vm2925_vm0, %v2924_v1 }
 0x1e3   : > { %v747_v52 = vpop.permute.xlu0 %746  ;;  %v749_v54 = vpop.permute.xlu1 %748 }
 0x1e4   : > { %v811_v53 = vsel %vm760_vm1, %v747_v52, 0  ;;  %v857_v56 = vsel %vm760_vm1, %v749_v54, 0 }
 0x1e5   : > { %2365 = vmatpush3.bf16.xpose.msra.mxu1 %v811_v53 }
 0x1e6   : > { %2370 = vmatprep.subr.bf16.mxu1 %v2924_v1 }
 0x1e7   : > { %v739_v55 = vpop.permute.xlu0 %738  ;;  %v741_v58 = vpop.permute.xlu1 %740 }
 0x1eb   : > { %v751_v57 = vpop.permute.xlu0 %750  ;;  %v743_v60 = vpop.permute.xlu1 %742 }
 0x1ec   : > { %2367 = vmatmul.mubr.msk.bf16.vlgmr.msra.gmra.mxu1 %vm760_vm1, %v739_v55  ;;  %v903_v59 = vsel %vm760_vm1, %v751_v57, 0 }
 0x1ed   : > { %2371 = vmatpush3.bf16.xpose.msra.mxu1 %v857_v56  ;;  %2372 = vmatprep.mubr.msk.bf16.mxu1 %vm2925_vm0, %v2924_v1 }
 0x1ee   : > { %2376 = vmatprep.subr.bf16.mxu1 %v2924_v1 }
 0x1f4   : > { %2373 = vmatmul.mubr.msk.bf16.vlgmr.msra.gmra.mxu1 %vm760_vm1, %v741_v58 }
 0x1f5   : > { %2377 = vmatpush3.bf16.xpose.msra.mxu1 %v903_v59  ;;  %2378 = vmatprep.mubr.msk.bf16.mxu1 %vm2925_vm0, %v2924_v1 }
 0x1f6   : > { %2388 = vmatprep.subr.bf16.mxu1 %v2924_v1 }
 0x1fc   : > { %2379 = vmatmul.mubr.msk.bf16.vlgmr.msra.gmra.mxu1 %vm760_vm1, %v743_v60 }
 0x1fd   : > { %2390 = vmatprep.mubr.msk.bf16.mxu1 %vm2925_vm0, %v2924_v1 }
 0x23a   : > { %v801_v61 = vpop.f32.mrf.mxu1 }
 0x23b   : > { %v946_v62 = vsel %vm945_vm3, %v801_v61, -inf }
 0x23c   : > { %947 = vmax.xlane.f32.xlu0 %v946_v62  ;;  %v2362_v63 = vpop.f32.mrf.mxu1 }
 0x23e   : > { %v804_v2 = vpop.f32.mrf.mxu1 }
 0x240   : > { %v2363_v3 = vpop.f32.mrf.mxu1 }
 0x2ac   : > { %v847_v4 = vpop.f32.mrf.mxu1 }
 0x2ad   : > { %v949_v5 = vsel %vm945_vm3, %v847_v4, -inf }
 0x2ae   : > { %950 = vmax.xlane.f32.xlu1 %v949_v5  ;;  %v2368_v6 = vpop.f32.mrf.mxu1 }
 0x2af   : > { %v2568_v6 = vld [vmem:[#allocation7 + $0x30] sm:$0xff]  }
 0x2b0   : > { %v850_v7 = vpop.f32.mrf.mxu1 }
 0x2b2   : > { %v2369_v8 = vpop.f32.mrf.mxu1 }
 0x2b4   : > { %v893_v9 = vpop.f32.mrf.mxu1 }
 0x2b5   : > { %v952_v10 = vsel %vm945_vm3, %v893_v9, -inf }
 0x2b6   : > { %953 = vmax.xlane.f32.xlu0 %v952_v10  ;;  %v2374_v11 = vpop.f32.mrf.mxu1 }
 0x2b7   : > { %v2570_v11 = vld [vmem:[#allocation7 + $0x20] sm:$0xff]  }
 0x2b8   : > { %v896_v12 = vpop.f32.mrf.mxu1 }
 0x2b9   : > { %v2571_v12 = vld [vmem:[#allocation7 + $0x18] sm:$0xff]  }
 0x2ba   : > { %v2375_v13 = vpop.f32.mrf.mxu1 }
 0x2bb   : > { %v2572_v13 = vld [vmem:[#allocation7 + $0x10] sm:$0xff]  }
 0x2bc   : > { %v939_v14 = vpop.f32.mrf.mxu1 }
 0x2bd   : > { %v955_v15 = vsel %vm945_vm3, %v939_v14, -inf }
 0x2be   : > { %956 = vmax.xlane.f32.xlu0 %v955_v15  ;;  %v2380_v16 = vpop.f32.mrf.mxu1 }
 0x2bf   : > { %754 = vrot.lane.b32.xlu1 %v3211_v50, %s2927_s22 }
 0x2c0   : > { %v942_v17 = vpop.f32.mrf.mxu1 }
 0x2c1   : > { %v2574_v17 = vld [vmem:[#allocation7] sm:$0xff]  }
 0x2c2   : > { %v2381_v18 = vpop.f32.mrf.mxu1 }
 0x2c5   : > { %v948_v19 = vpop.xlane.xlu0 %947 }
 0x2c6   : > { %v958_v20 = vsub.f32 %v801_v61, %v948_v19 }
 0x2c8   : > { %v962_v21 = vmul.f32 1.442695, %v958_v20 }
 0x2ca   : > { %2655 = vpow2.f32 %v962_v21 }
 0x2d7   : > { %v2656_v22 = vpop.eup %2655 }
 0x2d8   : > { %v970_v23 = vsel %vm945_vm3, %v2656_v22, 0.0 }
 0x2e3   : > { %971 = vadd.xlane.f32.xlu1 %v970_v23 }
 0x337   : > { %v951_v25 = vpop.xlane.xlu1 %950 }
 0x338   : > { %v959_v26 = vsub.f32 %v847_v4, %v951_v25  ;;  %v2567_v4 = vld [vmem:[#allocation7 + $0x38] sm:$0xff]  }
 0x33a   : > { %v964_v27 = vmul.f32 1.442695, %v959_v26 }
 0x33b   : > { %v755_v31 = vpop.permute.xlu1 %754 }
 0x33c   : > { %2657 = vpow2.f32 %v964_v27  ;;  %v1045_v32 = vsel %vm997_vm2, %v755_v31, 0 }
 0x33d   : > { %2389 = vmatpush3.bf16.msra.mxu1 %v1045_v32 }
 0x33e   : > { %2400 = vmatprep.subr.bf16.mxu1 %v2924_v1 }
 0x33f   : > { %v954_v33 = vpop.xlane.xlu0 %953 }
 0x340   : > { %v960_v34 = vsub.f32 %v893_v9, %v954_v33  ;;  %v2569_v9 = vld [vmem:[#allocation7 + $0x28] sm:$0xff]  }
 0x342   : > { %v966_v35 = vmul.f32 1.442695, %v960_v34 }
 0x344   : > { %2659 = vpow2.f32 %v966_v35 }
 0x347   : > { %v957_v36 = vpop.xlane.xlu0 %956 }
 0x348   : > { %v961_v37 = vsub.f32 %v939_v14, %v957_v36  ;;  %v2573_v14 = vld [vmem:[#allocation7 + $0x8] sm:$0xff]  }
 0x349   : > { %v2658_v38 = vpop.eup %2657 }
 0x34a   : > { %v968_v39 = vmul.f32 1.442695, %v961_v37  ;;  %v973_v40 = vsel %vm945_vm3, %v2658_v38, 0.0 }
 0x34b   : > { %974 = vadd.xlane.f32.xlu0 %v973_v40 }
 0x34c   : > { %2661 = vpow2.f32 %v968_v39  ;;  %v475_v39 = vunpack.c.l.bf16 %v3171_v24  ;;  %v2584_v24 = vld [vmem:[#allocation10 + $0xc8] ss:$16 sps:$4 sm:$0xff]  }
 0x351   : > { %v2660_v41 = vpop.eup %2659 }
 0x352   : > { %v976_v42 = vsel %vm945_vm3, %v2660_v41, 0.0 }
 0x353   : > { %977 = vadd.xlane.f32.xlu1 %v976_v42 }
 0x359   : > { %v2662_v44 = vpop.eup %2661 }
 0x35a   : > { %v979_v45 = vsel %vm945_vm3, %v2662_v44, 0.0 }
 0x35b   : > { %980 = vadd.xlane.f32.xlu0 %v979_v45 }
 0x364   : > { %758 = vrot.lane.b32.xlu1 %v3211_v50, %s2928_s29 }
 0x36c   : > { %v972_v46 = vpop.xlane.xlu1 %971 }
 0x36d   : > { %2663 = vrcp.f32 %v972_v46 }
 0x371   : > { %756 = vrot.lane.b32.xlu0 %v3211_v50, %s2926_s24 }
 0x37a   : > { %v2664_v47 = vpop.eup %2663 }
 0x37b   : > { %v983_v48 = vmul.f32 %v2664_v47, %v2656_v22  ;;  %v2575_v47 = vld [vmem:[#allocation10 + $0xe0] ss:$16 sps:$4 sm:$0xff]  }
 0x37d   : > { %v990_v49 = vpack.c.bf16 %v983_v48, %v983_v48  ;;  %v2577_v48 = vld [vmem:[#allocation10 + $0xe4] ss:$16 sps:$4 sm:$0xff]  }
 0x37f   : > { %2385 = vmatmul.mubr.msk.bf16.vlgmr.msra.gmra.mxu0 %vm945_vm3, %v990_v49  ;;  %v2578_v49 = vld [vmem:[#allocation10 + $0xe8] ss:$16 sps:$4 sm:$0xff]  }
 0x380   : > { %2396 = vmatprep.mubr.msk.bf16.mxu0 %vm2925_vm0, %v2924_v1 }
 0x3d4   : > { %v975_v51 = vpop.xlane.xlu0 %974 }
 0x3d5   : > { %2665 = vrcp.f32 %v975_v51  ;;  %v2580_v51 = vld [vmem:[#allocation10 + $0xec] ss:$16 sps:$4 sm:$0xff]  }
 0x3dc   : > { %v978_v52 = vpop.xlane.xlu1 %977 }
 0x3dd   : > { %2667 = vrcp.f32 %v978_v52  ;;  %v2583_v52 = vld [vmem:[#allocation10 + $0xc4] ss:$16 sps:$4 sm:$0xff]  }
 0x3e0   : > { %v759_v55 = vpop.permute.xlu1 %758 }
 0x3e1   : > { %v1137_v50 = vsel %vm997_vm2, %v759_v55, 0 }
 0x3e2   : > { %v2666_v53 = vpop.eup %2665 }
 0x3e3   : > { %v985_v54 = vmul.f32 %v2666_v53, %v2658_v38  ;;  %v2180_v38 = vld [vmem:[#allocation8] ss:$0 sm:$0xff] }
 0x3e4   : > { %v981_v56 = vpop.xlane.xlu0 %980  ;;  %v2586_v53 = vld [vmem:[#allocation10 + $0xcc] ss:$16 sps:$4 sm:$0xff]  }
 0x3e5   : > { %2669 = vrcp.f32 %v981_v56  ;;  %v991_v57 = vpack.c.bf16 %v985_v54, %v985_v54 }
 0x3e7   : > { %2391 = vmatmul.mubr.msk.bf16.vlgmr.msra.gmra.mxu1 %vm945_vm3, %v991_v57 }
 0x3e8   : > { %2401 = vmatpush3.bf16.msra.mxu1 %v1137_v50  ;;  %v757_v58 = vpop.permute.xlu0 %756  ;;  %2402 = vmatprep.mubr.msk.bf16.mxu1 %vm2925_vm0, %v2924_v1  ;;  %v2589_v50 = vld [vmem:[#allocation10 + $0xa4] ss:$16 sps:$4 sm:$0xff]  }
 0x3e9   : > { %v1091_v59 = vsel %vm997_vm2, %v757_v58, 0  ;;  %1550 = vmatprep.subr.bf16.mxu1 %v2577_v48  ;;  %v2592_v58 = vld [vmem:[#allocation10 + $0xac] ss:$16 sps:$4 sm:$0xff]   ;;  %v2638_v48 = vld [vmem:[#allocation11 + $0xa0] sm:$0xff]  }
 0x3ea   : > { %v2668_v60 = vpop.eup %2667  ;;  %2395 = vmatpush3.bf16.msra.mxu0 %v1091_v59  ;;  %v2587_v59 = vld [vmem:[#allocation10 + $0xa0] ss:$16 sps:$4 sm:$0xff]  }
 0x3eb   : > { %v987_v61 = vmul.f32 %v2668_v60, %v2660_v41  ;;  %2406 = vmatprep.subr.bf16.mxu0 %v2924_v1  ;;  %v2590_v60 = vld [vmem:[#allocation10 + $0xa8] ss:$16 sps:$4 sm:$0xff]  }
 0x3ed   : > { %v992_v62 = vpack.c.bf16 %v987_v61, %v987_v61  ;;  %v2593_v61 = vld [vmem:[#allocation10 + $0x80] ss:$16 sps:$4 sm:$0xff]  }
 0x3ef   : > { %2397 = vmatmul.mubr.msk.bf16.vlgmr.msra.gmra.mxu0 %vm945_vm3, %v992_v62  ;;  %v2595_v62 = vld [vmem:[#allocation10 + $0x84] ss:$16 sps:$4 sm:$0xff]  }
 0x3f0   : > { %2422 = vmatprep.mubr.msk.bf16.mxu0 %vm2925_vm0, %v2924_v1  ;;  %2407 = vmatpush3.bf16.msra.mxu0 %v2567_v4  ;;  %v2604_v4 = vld [vmem:[#allocation10 + $0x6c] ss:$16 sps:$4 sm:$0xff]  }
 0x3f1   : > { %2408 = vmatprep.subr.bf16.mxu0 %v2924_v1 }
 0x3f2   : > { %v2670_v63 = vpop.eup %2669 }
 0x3f3   : > { %v989_v2 = vmul.f32 %v2670_v63, %v2662_v44  ;;  %v2596_v63 = vld [vmem:[#allocation10 + $0x88] ss:$16 sps:$4 sm:$0xff]  }
 0x3f4   : > { %2409 = vmatpush3.bf16.msra.mxu0 %v2568_v6  ;;  %v2602_v6 = vld [vmem:[#allocation10 + $0x68] ss:$16 sps:$4 sm:$0xff]  }
 0x3f5   : > { %v993_v3 = vpack.c.bf16 %v989_v2, %v989_v2  ;;  %2410 = vmatprep.subr.bf16.mxu0 %v2924_v1  ;;  %v2598_v2 = vld [vmem:[#allocation10 + $0x8c] ss:$16 sps:$4 sm:$0xff]  }
 0x3f7   : > { %2403 = vmatmul.mubr.msk.bf16.vlgmr.msra.gmra.mxu1 %vm945_vm3, %v993_v3  ;;  %v2601_v3 = vld [vmem:[#allocation10 + $0x64] ss:$16 sps:$4 sm:$0xff]  }
 0x3f8   : > { %1582 = vmatprep.mubr.bf16.mxu1 %v2923_v0  ;;  %2411 = vmatpush3.bf16.msra.mxu0 %v2569_v9  ;;  %v2605_v9 = vld [vmem:[#allocation10 + $0x40] ss:$16 sps:$4 sm:$0xff]  }
 0x3f9   : > { %2412 = vmatprep.subr.bf16.mxu0 %v2924_v1  ;;  %1551 = vmatpush1.bf16.msra.mxu1 %v2575_v47  ;;  %v2637_v47 = vld [vmem:[#allocation11 + $0x20] sm:$0xff]  }
 0x3fa   : > { %1552 = vmatprep.subr.bf16.mxu1 %v2583_v52  ;;  %v2641_v52 = vld [vmem:[#allocation11 + $0x18] sm:$0xff]  }
 0x3fc   : > { %2413 = vmatpush3.bf16.msra.mxu0 %v2570_v11  ;;  %v2613_v11 = vld [vmem:[#allocation10 + $0x24] ss:$16 sps:$4 sm:$0xff]  }
 0x3fd   : > { %2414 = vmatprep.subr.bf16.mxu0 %v2924_v1 }
 0x400   : > { %2415 = vmatpush3.bf16.msra.mxu0 %v2571_v12  ;;  %v2616_v12 = vld [vmem:[#allocation10 + $0x2c] ss:$16 sps:$4 sm:$0xff]  }
 0x401   : > { %2416 = vmatprep.subr.bf16.mxu0 %v2924_v1 }
 0x404   : > { %2417 = vmatpush3.bf16.msra.mxu0 %v2572_v13  ;;  %v2611_v13 = vld [vmem:[#allocation10 + $0x20] ss:$16 sps:$4 sm:$0xff]  }
 0x405   : > { %2418 = vmatprep.subr.bf16.mxu0 %v2924_v1 }
 0x408   : > { %2419 = vmatpush3.bf16.msra.mxu0 %v2573_v14  ;;  %v2614_v14 = vld [vmem:[#allocation10 + $0x28] ss:$16 sps:$4 sm:$0xff]  }
 0x409   : > { %2420 = vmatprep.subr.bf16.mxu0 %v2924_v1 }
 0x40c   : > { %2421 = vmatpush3.bf16.msra.mxu0 %v2574_v17  ;;  %v2617_v17 = vld [vmem:[#allocation10] ss:$16 sps:$4 sm:$0xff]  }
 0x40d   : > { %1591 = vmatprep.subr.bf16.mxu0 %v2580_v51  ;;  %v2640_v51 = vld [vmem:[#allocation11 + $0xd8] sm:$0xff]  }
 0x43f   : > { %v1035_v5 = vpop.f32.mrf.mxu0 }
 0x441   : > { %v2386_v7 = vpop.f32.mrf.mxu0 }
 0x442   : > { %v2607_v7 = vld [vmem:[#allocation10 + $0x44] ss:$16 sps:$4 sm:$0xff]  }
 0x443   : > { %v1038_v8 = vpop.f32.mrf.mxu0 }
 0x444   : > { %v2610_v8 = vld [vmem:[#allocation10 + $0x4c] ss:$16 sps:$4 sm:$0xff]  }
 0x445   : > { %v2387_v10 = vpop.f32.mrf.mxu0 }
 0x446   : > { %v2608_v10 = vld [vmem:[#allocation10 + $0x48] ss:$16 sps:$4 sm:$0xff]  }
 0x4a7   : > { %v1081_v15 = vpop.f32.mrf.mxu1 }
 0x4a8   : > { %1180 = vrot.lane.b32.xlu1 %v1081_v15, %s2928_s29  ;;  %v2619_v15 = vld [vmem:[#allocation10 + $0x4] ss:$16 sps:$4 sm:$0xff]   ;;  %s2010_s29 = scalar_lea.hbm %s3353_s11, %s2257_s7 }
 0x4a9   : > { %v2392_v16 = vpop.f32.mrf.mxu1 }
 0x4aa   : > { %v2622_v16 = vld [vmem:[#allocation10 + $0xc] ss:$16 sps:$4 sm:$0xff]  }
 0x4ab   : > { %v1084_v18 = vpop.f32.mrf.mxu1 }
 0x4ac   : > { %v2620_v18 = vld [vmem:[#allocation10 + $0x8] ss:$16 sps:$4 sm:$0xff]  }
 0x4ad   : > { %v2393_v19 = vpop.f32.mrf.mxu1 }
 0x4ae   : > { %v2623_v19 = vld [vmem:[#allocation11 + $0x78] sm:$0xff]  }
 0x4af   : > { %v1127_v20 = vpop.f32.mrf.mxu0 }
 0x4b0   : > { %1184 = vrot.lane.b32.xlu0 %v1127_v20, %s2926_s24  ;;  %v2624_v20 = vld [vmem:[#allocation11 + $0xf8] sm:$0xff]  }
 0x4b1   : > { %v2398_v21 = vpop.f32.mrf.mxu0 }
 0x4b3   : > { %v1130_v22 = vpop.f32.mrf.mxu0 }
 0x4b5   : > { %v2399_v23 = vpop.f32.mrf.mxu0 }
 0x4b7   : > { %v1173_v25 = vpop.f32.mrf.mxu1 }
 0x4b8   : > { %1188 = vrot.lane.b32.xlu1 %v1173_v25, %s2927_s22 }
 0x4b9   : > { %v2404_v26 = vpop.f32.mrf.mxu1 }
 0x4ba   : > { %v3277_v26 = vld [vmem:[%s3351_s9] ss:$0 sm:$0xff] }
 0x4bb   : > { %v1176_v27 = vpop.f32.mrf.mxu1 }
 0x4bd   : > { %v2405_v31 = vpop.f32.mrf.mxu1 }
 0x4be   : > { %v3282_v31 = vld [vmem:[%s3352_s10] ss:$0 sm:$0xff] }
 0x51a   : > { %v1181_v32 = vpop.permute.xlu1 %1180 }
 0x51b   : > { %v1191_v1 = vsel %vm760_vm1, %v1035_v5, %v1181_v32  ;;  %v2599_v5 = vld [vmem:[#allocation10 + $0x60] ss:$16 sps:$4 sm:$0xff]  }
 0x522   : > { %v1185_v33 = vpop.permute.xlu0 %1184 }
 0x523   : > { %v1193_v34 = vsel %vm1192_vm4, %v1191_v1, %v1185_v33  ;;  %v2625_v1 = vld [vmem:[#allocation11 + $0x38] sm:$0xff]  }
 0x52a   : > { %v1189_v35 = vpop.permute.xlu1 %1188 }
 0x52b   : > { %v1195_v36 = vsel %vm1194_vm5, %v1193_v34, %v1189_v35  ;;  %v2626_v34 = vld [vmem:[#allocation11 + $0xb8] sm:$0xff]  }
 0x52c   : > { %v1196_v37 = vpack.c.bf16 %v1195_v36, %v1195_v36  ;;  %v2627_v36 = vld [vmem:[#allocation11 + $0x70] sm:$0xff]  }
 0x52e   : > { %2423 = vmatmul.mubr.bf16.vlgmr.msra.gmra.mxu0 %v1196_v37  ;;  %v2628_v37 = vld [vmem:[#allocation11 + $0xf0] sm:$0xff]  }
 0x52f   : > { %1623 = vmatprep.mubr.bf16.mxu0 %v2923_v0  ;;  %v2581_v0 = vld [vmem:[#allocation10 + $0xc0] ss:$16 sps:$4 sm:$0xff]   ;;  %1592 = vmatpush1.bf16.msra.mxu0 %v2578_v49  ;;  %v2639_v49 = vld [vmem:[#allocation11 + $0x58] sm:$0xff]  }
 0x530   : > { %1593 = vmatprep.subr.bf16.mxu0 %v2586_v53  ;;  %1553 = vmatpush1.bf16.msra.mxu1 %v2581_v0  ;;  %v2642_v53 = vld [vmem:[#allocation11 + $0x98] sm:$0xff]   ;;  %v2643_v0 = vld [vmem:[#allocation11 + $0x50] sm:$0xff]  }
 0x531   : > { %1554 = vmatprep.subr.bf16.mxu1 %v2589_v50  ;;  %v2649_v50 = vld [vmem:[#allocation11 + $0x8] sm:$0xff]  }
 0x533   : > { %1594 = vmatpush1.bf16.msra.mxu0 %v2584_v24  ;;  %v2644_v24 = vld [vmem:[#allocation11 + $0xd0] sm:$0xff]  }
 0x534   : > { %1595 = vmatprep.subr.bf16.mxu0 %v2592_v58  ;;  %1555 = vmatpush1.bf16.msra.mxu1 %v2587_v59  ;;  %v2650_v58 = vld [vmem:[#allocation11 + $0x88] sm:$0xff]   ;;  %v2651_v59 = vld [vmem:[#allocation11 + $0x40] sm:$0xff]  }
 0x535   : > { %1556 = vmatprep.subr.bf16.mxu1 %v2595_v62  ;;  %v2654_v62 = vld [vmem:[#allocation11 + $0x80] sm:$0xff]  }
 0x537   : > { %1596 = vmatpush1.bf16.msra.mxu0 %v2590_v60  ;;  %v2652_v60 = vld [vmem:[#allocation11 + $0xc0] sm:$0xff]  }
 0x538   : > { %1597 = vmatprep.subr.bf16.mxu0 %v2598_v2  ;;  %1557 = vmatpush1.bf16.msra.mxu1 %v2593_v61  ;;  %v2653_v61 = vld [vmem:[#allocation11] sm:$0xff]   ;;  %v1384_v2 = vsub.s32 3, %v3186_v28 }
 0x539   : > { %1558 = vmatprep.subr.bf16.mxu1 %v2601_v3 }
 0x53b   : > { %1598 = vmatpush1.bf16.msra.mxu0 %v2596_v63  ;;  %v1368_v63 = vld [vmem:[%s3348_s6] sm:$0xf] }
 0x53c   : > { %1599 = vmatprep.subr.bf16.mxu0 %v2604_v4  ;;  %1559 = vmatpush1.bf16.msra.mxu1 %v2599_v5  ;;  %v1373_v3 = vrot.slane %v1368_v63, %v514_v30  ;;  %v1381_v4 = vrot.slane %v1368_v63, %v522_v43  ;;  %v1377_v5 = vrot.slane %v1368_v63, %v518_v29 }
 0x53d   : > { %1560 = vmatprep.subr.bf16.mxu1 %v2607_v7 }
 0x53f   : > { %1600 = vmatpush1.bf16.msra.mxu0 %v2602_v6  ;;  %v1385_v6 = vrot.slane %v1368_v63, %v1384_v2 }
 0x540   : > { %1601 = vmatprep.subr.bf16.mxu0 %v2610_v8  ;;  %1561 = vmatpush1.bf16.msra.mxu1 %v2605_v9 }
 0x541   : > { %1562 = vmatprep.subr.bf16.mxu1 %v2613_v11 }
 0x543   : > { %1602 = vmatpush1.bf16.msra.mxu0 %v2608_v10 }
 0x544   : > { %1603 = vmatprep.subr.bf16.mxu0 %v2616_v12  ;;  %1563 = vmatpush1.bf16.msra.mxu1 %v2611_v13 }
 0x545   : > { %1564 = vmatprep.subr.bf16.mxu1 %v2619_v15 }
 0x547   : > { %1604 = vmatpush1.bf16.msra.mxu0 %v2614_v14 }
 0x548   : > { %1605 = vmatprep.subr.bf16.mxu0 %v2622_v16  ;;  %1565 = vmatpush1.bf16.msra.mxu1 %v2617_v17 }
 0x549   : > { %2294 = vmatprep.subr.bf16.mxu1 %v2623_v19 }
 0x54b   : > { %1606 = vmatpush1.bf16.msra.mxu0 %v2620_v18 }
 0x54c   : > { %2316 = vmatprep.subr.bf16.mxu0 %v2624_v20 }
 0x5ee   : > { %v1302_v40 = vpop.f32.mrf.mxu0 }
 0x5ef   : > { %v1303_v41 = vadd.f32 %v2180_v38, %v1302_v40  ;;  %v2629_v38 = vld [vmem:[#allocation11 + $0x30] sm:$0xff]   ;;  %v2631_v40 = vld [vmem:[#allocation11 + $0x68] sm:$0xff]  }
 0x5f0   : > { %v2424_v42 = vpop.f32.mrf.mxu0 }
 0x5f1   : > { %v1308_v44 = vadd.f32 %v1303_v41, %v475_v39  ;;  %v2630_v39 = vld [vmem:[#allocation11 + $0xb0] sm:$0xff]   ;;  %v2632_v41 = vld [vmem:[#allocation11 + $0xe8] sm:$0xff]  }
 0x5f2   : > { %v1305_v45 = vpop.f32.mrf.mxu0  ;;  %v2633_v42 = vld [vmem:[#allocation11 + $0x28] sm:$0xff]  }
 0x5f3   : > { %1309 = vadd.xlane.f32.xlu0 %v1308_v44  ;;  %v2635_v45 = vld [vmem:[#allocation11 + $0x60] sm:$0xff]  }
 0x5f4   : > { %v2425_v46 = vpop.f32.mrf.mxu0 }
 0x5f5   : > { %v2636_v46 = vld [vmem:[#allocation11 + $0xe0] sm:$0xff]  }
 0x67c   : > { %v1310_v54 = vpop.xlane.xlu0 %1309 }
 0x67d   : > { %v1312_v55 = vmul.f32 0.0078125, %v1310_v54  ;;  %v2645_v54 = vld [vmem:[#allocation11 + $0x10] sm:$0xff]  }
 0x67f   : > { %v1313_v56 = vsub.f32 %v1308_v44, %v1312_v55  ;;  %v2634_v44 = vld [vmem:[#allocation11 + $0xa8] sm:$0xff]   ;;  %v2646_v55 = vld [vmem:[#allocation11 + $0x90] sm:$0xff]  }
 0x681   : > { %v1314_v57 = vmul.f32 %v1313_v56, %v1313_v56 }
 0x683   : > { %1315 = vadd.xlane.f32.xlu1 %v1314_v57  ;;  %v2648_v57 = vld [vmem:[#allocation11 + $0xc8] sm:$0xff]  }
 0x70c   : > { %v1316_v21 = vpop.xlane.xlu1 %1315 }
 0x70d   : > { %v1317_v22 = vmul.f32 0.0078125, %v1316_v21 }
 0x70f   : > { %v1318_v23 = vadd.f32 1e-05, %v1317_v22 }
 0x711   : > { %2671 = vrsqrt.f32 %v1318_v23 }
 0x71e   : > { %v2672_v25 = vpop.eup %2671 }
 0x71f   : > { %v1320_v27 = vmul.f32 %v2672_v25, %v1313_v56  ;;  %v2647_v56 = vld [vmem:[#allocation11 + $0x48] sm:$0xff]  }
 0x721   : > { %v1327_v32 = vmul.f32 %v3277_v26, %v1320_v27  ;;  %v2223_v27 = vld [vmem:[%s3350_s8] ss:$0 sm:$0xff] }
 0x723   : > { %v3286_v33 = vadd.f32 %v3282_v31, %v1327_v32 }
 0x725   : > { %v1335_v35 = vpack.c.bf16 %v3286_v33, %v3286_v33 }
 0x727   : > { %1583 = vmatmul.mubr.bf16.vlgmr.msra.gmra.mxu1 %v1335_v35  ;;  %1624 = vmatmul.mubr.bf16.vlgmr.msra.gmra.mxu0 %v1335_v35 }
 0x728   : > { %2295 = vmatpush3.bf16.msra.mxu1 %v2625_v1  ;;  %2317 = vmatpush3.bf16.msra.mxu0 %v2626_v34 }
 0x729   : > { %2296 = vmatprep.subr.bf16.mxu1 %v2627_v36  ;;  %2318 = vmatprep.subr.bf16.mxu0 %v2628_v37 }
 0x72c   : > { %2297 = vmatpush3.bf16.msra.mxu1 %v2629_v38  ;;  %2319 = vmatpush3.bf16.msra.mxu0 %v2630_v39 }
 0x72d   : > { %2298 = vmatprep.subr.bf16.mxu1 %v2631_v40  ;;  %2320 = vmatprep.subr.bf16.mxu0 %v2632_v41 }
 0x730   : > { %2299 = vmatpush3.bf16.msra.mxu1 %v2633_v42  ;;  %2321 = vmatpush3.bf16.msra.mxu0 %v2634_v44 }
 0x731   : > { %2300 = vmatprep.subr.bf16.mxu1 %v2635_v45  ;;  %2322 = vmatprep.subr.bf16.mxu0 %v2636_v46 }
 0x734   : > { %2301 = vmatpush3.bf16.msra.mxu1 %v2637_v47  ;;  %2323 = vmatpush3.bf16.msra.mxu0 %v2638_v48 }
 0x735   : > { %2302 = vmatprep.subr.bf16.mxu1 %v2639_v49  ;;  %2324 = vmatprep.subr.bf16.mxu0 %v2640_v51 }
 0x738   : > { %2303 = vmatpush3.bf16.msra.mxu1 %v2641_v52  ;;  %2325 = vmatpush3.bf16.msra.mxu0 %v2642_v53 }
 0x739   : > { %2304 = vmatprep.subr.bf16.mxu1 %v2643_v0  ;;  %2326 = vmatprep.subr.bf16.mxu0 %v2644_v24 }
 0x73c   : > { %2305 = vmatpush3.bf16.msra.mxu1 %v2645_v54  ;;  %2327 = vmatpush3.bf16.msra.mxu0 %v2646_v55 }
 0x73d   : > { %2306 = vmatprep.subr.bf16.mxu1 %v2647_v56  ;;  %2328 = vmatprep.subr.bf16.mxu0 %v2648_v57 }
 0x740   : > { %2307 = vmatpush3.bf16.msra.mxu1 %v2649_v50  ;;  %2329 = vmatpush3.bf16.msra.mxu0 %v2650_v58 }
 0x741   : > { %2308 = vmatprep.subr.bf16.mxu1 %v2651_v59  ;;  %2330 = vmatprep.subr.bf16.mxu0 %v2652_v60 }
 0x744   : > { %2309 = vmatpush3.bf16.msra.mxu1 %v2653_v61  ;;  %2331 = vmatpush3.bf16.msra.mxu0 %v2654_v62 }
 0x7e7   : > { %v1584_v7 = vpop.f32.mrf.mxu1  ;;  %v1625_v8 = vpop.f32.mrf.mxu0 }
 0x7e8   : > { %v1585_v9 = vadd.f32 %v1584_v7, %v1373_v3  ;;  %v1626_v10 = vadd.f32 %v1625_v8, %v1381_v4 }
 0x7e9   : > { %v1586_v11 = vpop.f32.mrf.mxu1  ;;  %v1627_v12 = vpop.f32.mrf.mxu0 }
 0x7ea   : > { %v1587_v13 = vadd.f32 %v1586_v11, %v1377_v5  ;;  %v1628_v14 = vadd.f32 %v1627_v12, %v1385_v6  ;;  %v1632_v15 = vmax.f32 %v1585_v9, 0.0  ;;  %v1634_v16 = vmax.f32 %v1626_v10, 0.0 }
 0x7eb   : > { %v1588_v17 = vpop.f32.mrf.mxu1  ;;  %v1629_v18 = vpop.f32.mrf.mxu0 }
 0x7ec   : > { %v1633_v30 = vmax.f32 %v1587_v13, 0.0  ;;  %v1635_v19 = vmax.f32 %v1628_v14, 0.0  ;;  %v1636_v29 = vpack.c.bf16 %v1632_v15, %v1632_v15  ;;  %v1638_v22 = vpack.c.bf16 %v1634_v16, %v1634_v16 }
 0x7ed   : > { %v1589_v20 = vpop.f32.mrf.mxu1  ;;  %v1630_v43 = vpop.f32.mrf.mxu0 }
 0x7ee   : > { %v1637_v21 = vpack.c.bf16 %v1633_v30, %v1633_v30  ;;  %v1639_v28 = vpack.c.bf16 %v1635_v19, %v1635_v19 }
 0x7f0   : > { %1935 = vmatprep.mubr.bf16.mxu1 %v1637_v21  ;;  %1975 = vmatprep.mubr.bf16.mxu0 %v1639_v28 }
 0x7f1   : > { %1936 = vmatmul.mubr.bf16.vlgmr.msra.gmra.mxu1 %v1636_v29  ;;  %1976 = vmatmul.mubr.bf16.vlgmr.msra.gmra.mxu0 %v1638_v22 }
 0x8b1   : > { %v2310_v23 = vpop.f32.mrf.mxu1  ;;  %v2332_v25 = vpop.f32.mrf.mxu0 }
 0x8b3   : > { %v2311_v32 = vpop.f32.mrf.mxu1  ;;  %v2333_v1 = vpop.f32.mrf.mxu0 }
 0x8b4   : > { %v2312_v34 = vadd.f32 %v2311_v32, %v2310_v23  ;;  %v2334_v38 = vadd.f32 %v2333_v1, %v2332_v25 }
 0x8b5   : > { %v2313_v35 = vpop.f32.mrf.mxu1  ;;  %v2335_v36 = vpop.f32.mrf.mxu0 }
 0x8b6   : > { %v1938_v37 = vadd.f32 %v2312_v34, %v2223_v27 }
 0x8b7   : > { %v2314_v39 = vpop.f32.mrf.mxu1  ;;  %v2336_v40 = vpop.f32.mrf.mxu0 }
 0x8b8   : > { %v1978_v41 = vadd.f32 %v2334_v38, %v1938_v37 }
 0x8ba   : > { %v1983_v42 = vadd.f32 %v1978_v41, %v3286_v33 }
 0x8bc   : > { %1984 = vadd.xlane.f32.xlu0 %v1983_v42 }
 0x945   : > { %v1985_v44 = vpop.xlane.xlu0 %1984 }
 0x946   : > { %v1986_v45 = vmul.f32 0.0078125, %v1985_v44 }
 0x948   : > { %v1987_v46 = vsub.f32 %v1983_v42, %v1986_v45 }
 0x94a   : > { %v1988_v47 = vmul.f32 %v1987_v46, %v1987_v46 }
 0x94c   : > { %1989 = vadd.xlane.f32.xlu0 %v1988_v47 }
 0x9d5   : > { %v1990_v48 = vpop.xlane.xlu0 %1989 }
 0x9d6   : > { %v1991_v49 = vmul.f32 0.0078125, %v1990_v48 }
 0x9d8   : > { %v1992_v51 = vadd.f32 1e-05, %v1991_v49 }
 0x9da   : > { %2673 = vrsqrt.f32 %v1992_v51 }
 0x9e7   : > { %v2674_v52 = vpop.eup %2673 }
 0x9e8   : > { %v1994_v53 = vmul.f32 %v2674_v52, %v1987_v46 }
 0x9ea   : > { %v1995_v33 = vmul.f32 %v3277_v26, %v1994_v53 }
 0x9ec   : > { %v1996_v0 = vadd.f32 %v3282_v31, %v1995_v33 }
 0x9ee   : > { %1997 = vst [vmem:[%s472_s1] sm:$0xff] %v1996_v0 }
 0x9ef   : > { %2846 = shalt.err (!%p2843_p1)
}
 0x9f0   : > { %s2847_s15 = scalar_lea.hbm %s2010_s29, 128  ;;  %s2851_s14 = scalar_lea.hbm %s3353_s11, 256 }
 0x9f1   : > { %p2848_p3 = scmp.ne.s32.totalorder %s2010_s29, %s2847_s15  ;;  %p2852_p10 = scmp.lt.s32.totalorder %s2010_s29, %s3353_s11 }
 0x9f2   : > { %p2853_p12 = scmp.lt.s32.totalorder %s2851_s14, %s2847_s15 }
 0x9f3   : > { %p2849_p8 = pnand %p2848_p3, %p3384_p5 }
 0x9f4   : > { %p2854_p13 = por %p2853_p12, %p2852_p10 }
 0x9f5   : > { %p2850_p6 = pneg %p2849_p8 }
 0x9f7   : > { %p2855_p4 = pnand %p2854_p13, %p2850_p6 }
 0x9f9   : > { %2858 = shalt.err (!%p2855_p4)
}
 0x9fa   : > { %2448 = dma.vmem_to_hbm [thread:$0]  (%p3384_p5), %s2013_s3, 128, %s2010_s29, %s1999_s28  }
 0x9fb PF: > { %s2024_s7 = sand.u32 1, %s2897_s17   ;;  %p3385_p9 = scmp.ne.s32.totalorder %s3374_s26, 0 }
 0x9fc   : > { %p3386_p11 = scmp.ge.s32.totalorder %s2909_s20, 2  ;;  %s2025_s1 = scalar_lea.sflag [#allocation4], %s2024_s7 }
 0x9fe   : > { %p2471_p7 = pnand %p3386_p11, %p3385_p9 }
 0xa00   : > { %p2472_p0 = pneg %p2471_p7 }
 0xa02   : > { %2892 = dma.done.wait (%p2472_p0), %s2025_s1, 128  }
 0xa03   : > { %2894 = vsyncadd (%p2472_p0), %s2025_s1, 4294967168  ;;  %s3387_s24 = sld [smem:[#allocation19_spill]]  ;;  %p27_p2 = scmp.ge.s32.totalorder %s3085_s30, 4  }
 0xa04   : > { %s3388_s17 = smov %s2901_s18  ;;  %s3389_s18 = smov %s2905_s19 }
 0xa05   : > { %s3391_s20 = smov %s3085_s30  ;;  %29 = sbr.rel (!%p27_p2) target bundleno = 14 (0xe), region = 129 }
 0xa09   : > { %s3390_s19 = smov %s3387_s24 }
 0xa0a   :  { %2030 = vsyncpa [#allocation3], 1 }
 0xa0b   :  { %2032 = vsyncpa [#allocation3 + $0x1], 1 }
 0xa0c   :  { %2033 = vsyncpa [#allocation6], 1 }
 0xa0d   :  { %2034 = vsyncpa [#allocation9], 1 }
 0xa0e   :  { %2035 = vsyncpa [#allocation12], 1 }
 0xa0f   :  { %2036 = vsyncpa [#allocation4], 1 }
 0xa10   :  { %2038 = vsyncpa [#allocation4 + $0x1], 1 }

</bundles_post_ra>
